<compile_context>
chip_gen: v7x
topology: tpu7x:2x2x1
jax: 0.10.0
libtpu: 0.0.40
codegen_flags: <defaults>
</compile_context>

<pallas_src>
import functools

import jax
import jax.numpy as jnp
from jax import lax
from jax.experimental import pallas as pl
from jax.experimental.pallas import tpu as pltpu


def self_attention_kernel(x_ref, w_ref, gamma_ref, o_ref, xbig_ref, proj_ref,
                          *, C, C8p, L, TJ):
    x = x_ref[0]                                              # (C, L) f32, lane-dense

    # k=3 / pad=1 conv taps via XLU rolls + boundary masks (no uninitialized VMEM).
    col = lax.broadcasted_iota(jnp.int32, (C, L), 1)
    x_prev = jnp.where(col == 0, 0.0, pltpu.roll(x, shift=1, axis=1))          # x[:, l-1]
    x_next = jnp.where(col == L - 1, 0.0, pltpu.roll(x, shift=L - 1, axis=1))  # x[:, l+1]

    # Stack the three shifted operands at 8-aligned row offsets -> one K=3C matmul.
    xbig_ref[0:C, :] = x_prev
    xbig_ref[C:2 * C, :] = x
    xbig_ref[2 * C:3 * C, :] = x_next

    # Fused projection: [f_pad; g_pad; h] = W_big @ X_big, bf16 operands, f32 accumulate.
    proj_ref[...] = jnp.dot(w_ref[...], xbig_ref[...].astype(jnp.bfloat16),
                            preferred_element_type=jnp.float32)               # (2*C8p+C, L)

    f_bf = proj_ref[0:C8p, :].astype(jnp.bfloat16)            # (C8p, L); rows >= C//8 are 0
    h_bf = proj_ref[2 * C8p:, :].astype(jnp.bfloat16)         # (C, L)
    gamma = gamma_ref[0]

    # Column-blocked attention.  softmax(dim=1) normalizes over rows (axis 0), so
    # column blocks are independent.  nblk is a small static count -> unrolled loop
    # (equivalent to lax.fori_loop(..., unroll=True); all slices are 128-aligned).
    for j in range(L // TJ):
        c0 = j * TJ
        g_bf = proj_ref[C8p:2 * C8p, c0:c0 + TJ].astype(jnp.bfloat16)         # (C8p, TJ)
        # s[i, jj] = sum_c f[c, i] * g[c, jj]   (zero-padded rows contribute nothing)
        s = lax.dot_general(f_bf, g_bf, (((0,), (0,)), ((), ())),
                            preferred_element_type=jnp.float32)               # (L, TJ)
        e = jnp.exp(s - jnp.max(s, axis=0, keepdims=True))
        inv = pl.reciprocal(jnp.sum(e, axis=0, keepdims=True), approx=True)   # (1, TJ)
        o = jnp.dot(h_bf, e.astype(jnp.bfloat16),
                    preferred_element_type=jnp.float32)                       # (C, TJ)
        o_ref[0, :, c0:c0 + TJ] = o * (gamma * inv) + x[:, c0:c0 + TJ]


def self_attention(x, wq, wk, wv, gamma, *, tj=128):
    """SAGAN-style self attention.

    x:  (N, C, H, W) float32
    wq: (C//8, C, 3), wk: (C//8, C, 3), wv: (C, C, 3)  -- conv weights (no bias)
    gamma: scalar
    """
    N, C, H, W = x.shape
    L = H * W
    C8 = C // 8
    assert C % 8 == 0 and C8 >= 1, "n_channels must be a positive multiple of 8"
    assert L % 128 == 0, "H*W must be a multiple of 128 (lane-dense blocks)"
    tj = min(tj, L)
    assert tj % 128 == 0 and L % tj == 0

    C8p = ((C8 + 7) // 8) * 8          # query/key out-channels padded to a sublane tile
    CT = 2 * C8p + C                   # fused projection output rows

    x_flat = x.reshape(N, C, L).astype(jnp.float32)

    def tapify(w, rows):
        # (C_out, C, 3) conv weight -> (rows, 3*C); column block t is the tap for offset t-1.
        w = jnp.pad(w, ((0, rows - w.shape[0]), (0, 0), (0, 0)))
        return jnp.transpose(w, (0, 2, 1)).reshape(rows, 3 * C)

    w_big = jnp.concatenate(
        [tapify(wq, C8p), tapify(wk, C8p), tapify(wv, C)], axis=0
    ).astype(jnp.bfloat16)             # (CT, 3C) MXU operand

    gamma_arr = jnp.asarray(gamma, jnp.float32).reshape((1,))

    kernel = functools.partial(self_attention_kernel, C=C, C8p=C8p, L=L, TJ=tj)
    out_flat = pl.pallas_call(
        kernel,
        out_shape=jax.ShapeDtypeStruct((N, C, L), jnp.float32),
        grid=(N,),
        in_specs=[
            pl.BlockSpec((1, C, L), lambda n: (n, 0, 0)),          # activations (lane-dense)
            pl.BlockSpec((CT, 3 * C), lambda n: (0, 0)),           # fused weights (VMEM-resident)
            pl.BlockSpec(memory_space=pltpu.MemorySpace.SMEM),     # gamma scalar
        ],
        out_specs=pl.BlockSpec((1, C, L), lambda n: (n, 0, 0)),
        scratch_shapes=[
            pltpu.VMEM((3 * C, L), jnp.float32),                   # stacked shifted operands
            pltpu.VMEM((CT, L), jnp.float32),                      # fused projection output
        ],
        compiler_params=pltpu.CompilerParams(dimension_semantics=("parallel",)),
    )(x_flat, w_big, gamma_arr)
    return out_flat.reshape(N, C, H, W)


def reference(x, wq, wk, wv, gamma):
    """Pure-JAX f32 reference matching the (intended) PyTorch forward semantics."""
    hi = lax.Precision.HIGHEST
    N, C, H, W = x.shape
    xf = x.reshape(N, C, H * W)

    def conv1d(inp, w):
        return lax.conv_general_dilated(
            inp, w, window_strides=(1,), padding=((1, 1),),
            dimension_numbers=("NCH", "OIH", "NCH"), precision=hi)

    f = conv1d(xf, wq)
    g = conv1d(xf, wk)
    h = conv1d(xf, wv)
    s = jnp.einsum("nci,ncj->nij", f, g, precision=hi)        # bmm(f^T, g)
    beta = jax.nn.softmax(s, axis=1)
    o = gamma * jnp.einsum("nci,nij->ncj", h, beta, precision=hi) + xf   # bmm(h, beta)
    return o.reshape(N, C, H, W)


if __name__ == "__main__":
    key = jax.random.PRNGKey(0)
    kx, kq, kk, kv = jax.random.split(key, 4)

    # n_channels must be a multiple of 8 so the query/key C//8 projections are nonempty.
    N, C, H, W = 2, 32, 16, 16
    C8 = C // 8
    x = jax.random.normal(kx, (N, C, H, W), dtype=jnp.float32)
    wq = 0.1 * jax.random.normal(kq, (C8, C, 3), dtype=jnp.float32)
    wk = 0.1 * jax.random.normal(kk, (C8, C, 3), dtype=jnp.float32)
    wv = 0.1 * jax.random.normal(kv, (C, C, 3), dtype=jnp.float32)
    # gamma is the module's learnable scalar (initialized to 0.0 in PyTorch); use a
    # nonzero value so the attention branch actually contributes to the check.
    gamma = jnp.float32(0.75)

    out = self_attention(x, wq, wk, wv, gamma)
    jax.block_until_ready(out)

    ref = reference(x, wq, wk, wv, gamma)
    assert out.shape == (N, C, H, W)
    # Kernel uses bf16 MXU operands with f32 accumulation (per perf review); the
    # reference is full-f32 HIGHEST precision, so the tolerance is loosened.
    err = float(jnp.max(jnp.abs(out - ref)))
    assert jnp.allclose(out, ref, atol=1e-1, rtol=1e-1), err
    print("KERNEL_OK")
</pallas_src>

<mosaic_0001>
module attributes {stable_mosaic.version = 11 : i64} {
  func.func @self_attention_kernel(%arg0: i32, %arg1: memref<1x32x256xf32, #tpu.memory_space<vmem>>, %arg2: memref<48x96xbf16, #tpu.memory_space<vmem>>, %arg3: memref<1xf32, #tpu.memory_space<smem>>, %arg4: memref<1x32x256xf32, #tpu.memory_space<vmem>>, %arg5: memref<96x256xf32, #tpu.memory_space<vmem>>, %arg6: memref<48x256xf32, #tpu.memory_space<vmem>>) attributes {dimension_semantics = [#tpu.dimension_semantics<parallel>], iteration_bounds = array<i64: 2>, scalar_prefetch = 0 : i64, scratch_operands = 2 : i64, tpu.core_type = #tpu.core_type<tc>, window_params = [{transform_indices = @transform_0, window_bounds = array<i64: 1, 32, 256>}, {pipeline_mode = #tpu.pipeline_mode<synchronous>, transform_indices = @transform_1, window_bounds = array<i64: 48, 96>}, {transform_indices = @transform_2, window_bounds = array<i64: 1>}, {transform_indices = @transform_3, window_bounds = array<i64: 1, 32, 256>}]} {
    %c0 = arith.constant 0 : index
    %c0_0 = arith.constant 0 : index
    %c0_1 = arith.constant 0 : index
    %0 = vector.load %arg1[%c0, %c0_0, %c0_1] : memref<1x32x256xf32, #tpu.memory_space<vmem>>, vector<1x32x256xf32>
    %1 = vector.shape_cast %0 : vector<1x32x256xf32> to vector<32x256xf32>
    %2 = tpu.iota {dimensions = array<i32: 1>} : vector<32x256xi32>
    %c0_i32 = arith.constant 0 : i32
    %3 = vector.broadcast %c0_i32 : i32 to vector<32x256xi32>
    %4 = arith.cmpi eq, %2, %3 : vector<32x256xi32>
    %c1_i32 = arith.constant 1 : i32
    %5 = tpu.dynamic_rotate %1 by %c1_i32 dim 1 : vector<32x256xf32>, i32 -> vector<32x256xf32>
    %cst = arith.constant 0.000000e+00 : f32
    %6 = vector.broadcast %cst : f32 to vector<32x256xf32>
    %7 = arith.select %4, %6, %5 : vector<32x256xi1>, vector<32x256xf32>
    %c255_i32 = arith.constant 255 : i32
    %8 = vector.broadcast %c255_i32 : i32 to vector<32x256xi32>
    %9 = arith.cmpi eq, %2, %8 : vector<32x256xi32>
    %c255_i32_2 = arith.constant 255 : i32
    %10 = tpu.dynamic_rotate %1 by %c255_i32_2 dim 1 : vector<32x256xf32>, i32 -> vector<32x256xf32>
    %cst_3 = arith.constant 0.000000e+00 : f32
    %11 = vector.broadcast %cst_3 : f32 to vector<32x256xf32>
    %12 = arith.select %9, %11, %10 : vector<32x256xi1>, vector<32x256xf32>
    %c0_4 = arith.constant 0 : index
    %c0_5 = arith.constant 0 : index
    %13 = vector.load %arg5[%c0_4, %c0_5] : memref<96x256xf32, #tpu.memory_space<vmem>>, vector<32x256xf32>
    tpu.vector_store %arg5[%c0_4, %c0_5], %7 {strides = array<i32>} : memref<96x256xf32, #tpu.memory_space<vmem>>, vector<32x256xf32>,
    %c32 = arith.constant 32 : index
    %c0_6 = arith.constant 0 : index
    %14 = vector.load %arg5[%c32, %c0_6] : memref<96x256xf32, #tpu.memory_space<vmem>>, vector<32x256xf32>
    tpu.vector_store %arg5[%c32, %c0_6], %1 {strides = array<i32>} : memref<96x256xf32, #tpu.memory_space<vmem>>, vector<32x256xf32>,
    %c64 = arith.constant 64 : index
    %c0_7 = arith.constant 0 : index
    %15 = vector.load %arg5[%c64, %c0_7] : memref<96x256xf32, #tpu.memory_space<vmem>>, vector<32x256xf32>
    tpu.vector_store %arg5[%c64, %c0_7], %12 {strides = array<i32>} : memref<96x256xf32, #tpu.memory_space<vmem>>, vector<32x256xf32>,
    %c0_8 = arith.constant 0 : index
    %c0_9 = arith.constant 0 : index
    %16 = vector.load %arg2[%c0_8, %c0_9] : memref<48x96xbf16, #tpu.memory_space<vmem>>, vector<48x96xbf16>
    %c0_10 = arith.constant 0 : index
    %c0_11 = arith.constant 0 : index
    %17 = vector.load %arg5[%c0_10, %c0_11] : memref<96x256xf32, #tpu.memory_space<vmem>>, vector<96x256xf32>
    %18 = arith.truncf %17 : vector<96x256xf32> to vector<96x256xbf16>
    %cst_12 = arith.constant dense<0.000000e+00> : vector<48x256xf32>
    %19 = tpu.matmul %16, %18, %cst_12 {dimension_numbers = #tpu.dot_dimension_numbers<[1], [0], [0], [1], [0, 0, 1, 1], [], []>} : vector<48x96xbf16>, vector<96x256xbf16>, vector<48x256xf32> -> vector<48x256xf32>
    %c0_13 = arith.constant 0 : index
    %c0_14 = arith.constant 0 : index
    %20 = vector.load %arg6[%c0_13, %c0_14] : memref<48x256xf32, #tpu.memory_space<vmem>>, vector<48x256xf32>
    tpu.vector_store %arg6[%c0_13, %c0_14], %19 {strides = array<i32>} : memref<48x256xf32, #tpu.memory_space<vmem>>, vector<48x256xf32>,
    %c0_15 = arith.constant 0 : index
    %c0_16 = arith.constant 0 : index
    %21 = vector.load %arg6[%c0_15, %c0_16] : memref<48x256xf32, #tpu.memory_space<vmem>>, vector<8x256xf32>
    %22 = arith.truncf %21 : vector<8x256xf32> to vector<8x256xbf16>
    %c16 = arith.constant 16 : index
    %c0_17 = arith.constant 0 : index
    %23 = vector.load %arg6[%c16, %c0_17] : memref<48x256xf32, #tpu.memory_space<vmem>>, vector<32x256xf32>
    %24 = arith.truncf %23 : vector<32x256xf32> to vector<32x256xbf16>
    %c0_18 = arith.constant 0 : index
    %25 = memref.load %arg3[%c0_18] : memref<1xf32, #tpu.memory_space<smem>>
    %c8 = arith.constant 8 : index
    %c0_19 = arith.constant 0 : index
    %26 = vector.load %arg6[%c8, %c0_19] : memref<48x256xf32, #tpu.memory_space<vmem>>, vector<8x128xf32>
    %27 = arith.truncf %26 : vector<8x128xf32> to vector<8x128xbf16>
    %cst_20 = arith.constant dense<0.000000e+00> : vector<256x128xf32>
    %28 = tpu.matmul %22, %27, %cst_20 {dimension_numbers = #tpu.dot_dimension_numbers<[0], [0], [1], [1], [0, 1, 1, 1], [], []>} : vector<8x256xbf16>, vector<8x128xbf16>, vector<256x128xf32> -> vector<256x128xf32>
    %cst_21 = arith.constant dense<0xFF800000> : vector<128xf32>
    %29 = vector.multi_reduction <maximumf>, %28, %cst_21 [0] : vector<256x128xf32> to vector<128xf32>
    %30 = vector.shape_cast %29 : vector<128xf32> to vector<1x128xf32>
    %31 = vector.broadcast %30 : vector<1x128xf32> to vector<256x128xf32>
    %32 = arith.subf %28, %31 : vector<256x128xf32>
    %33 = math.exp %32 : vector<256x128xf32>
    %cst_22 = arith.constant dense<0.000000e+00> : vector<128xf32>
    %34 = vector.multi_reduction <add>, %33, %cst_22 [0] : vector<256x128xf32> to vector<128xf32>
    %35 = vector.shape_cast %34 : vector<128xf32> to vector<1x128xf32>
    %36 = tpu.reciprocal %35 {approx = true} : vector<1x128xf32> -> vector<1x128xf32>
    %37 = arith.truncf %33 : vector<256x128xf32> to vector<256x128xbf16>
    %cst_23 = arith.constant dense<0.000000e+00> : vector<32x128xf32>
    %38 = tpu.matmul %24, %37, %cst_23 {dimension_numbers = #tpu.dot_dimension_numbers<[1], [0], [0], [1], [0, 0, 1, 1], [], []>} : vector<32x256xbf16>, vector<256x128xbf16>, vector<32x128xf32> -> vector<32x128xf32>
    %39 = vector.broadcast %25 : f32 to vector<1x128xf32>
    %40 = arith.mulf %39, %36 : vector<1x128xf32>
    %41 = vector.broadcast %40 : vector<1x128xf32> to vector<32x128xf32>
    %42 = arith.mulf %38, %41 : vector<32x128xf32>
    %43 = vector.extract_strided_slice %1 {offsets = [0, 0], sizes = [32, 128], strides = [1, 1]} : vector<32x256xf32> to vector<32x128xf32>
    %44 = arith.addf %42, %43 : vector<32x128xf32>
    %c0_24 = arith.constant 0 : index
    %c0_25 = arith.constant 0 : index
    %c0_26 = arith.constant 0 : index
    %45 = vector.load %arg4[%c0_24, %c0_25, %c0_26] : memref<1x32x256xf32, #tpu.memory_space<vmem>>, vector<1x32x128xf32>
    %46 = vector.shape_cast %45 : vector<1x32x128xf32> to vector<32x128xf32>
    %47 = vector.shape_cast %44 : vector<32x128xf32> to vector<1x32x128xf32>
    tpu.vector_store %arg4[%c0_24, %c0_25, %c0_26], %47 {strides = array<i32>} : memref<1x32x256xf32, #tpu.memory_space<vmem>>, vector<1x32x128xf32>,
    %c8_27 = arith.constant 8 : index
    %c128 = arith.constant 128 : index
    %48 = vector.load %arg6[%c8_27, %c128] : memref<48x256xf32, #tpu.memory_space<vmem>>, vector<8x128xf32>
    %49 = arith.truncf %48 : vector<8x128xf32> to vector<8x128xbf16>
    %cst_28 = arith.constant dense<0.000000e+00> : vector<256x128xf32>
    %50 = tpu.matmul %22, %49, %cst_28 {dimension_numbers = #tpu.dot_dimension_numbers<[0], [0], [1], [1], [0, 1, 1, 1], [], []>} : vector<8x256xbf16>, vector<8x128xbf16>, vector<256x128xf32> -> vector<256x128xf32>
    %cst_29 = arith.constant dense<0xFF800000> : vector<128xf32>
    %51 = vector.multi_reduction <maximumf>, %50, %cst_29 [0] : vector<256x128xf32> to vector<128xf32>
    %52 = vector.shape_cast %51 : vector<128xf32> to vector<1x128xf32>
    %53 = vector.broadcast %52 : vector<1x128xf32> to vector<256x128xf32>
    %54 = arith.subf %50, %53 : vector<256x128xf32>
    %55 = math.exp %54 : vector<256x128xf32>
    %cst_30 = arith.constant dense<0.000000e+00> : vector<128xf32>
    %56 = vector.multi_reduction <add>, %55, %cst_30 [0] : vector<256x128xf32> to vector<128xf32>
    %57 = vector.shape_cast %56 : vector<128xf32> to vector<1x128xf32>
    %58 = tpu.reciprocal %57 {approx = true} : vector<1x128xf32> -> vector<1x128xf32>
    %59 = arith.truncf %55 : vector<256x128xf32> to vector<256x128xbf16>
    %cst_31 = arith.constant dense<0.000000e+00> : vector<32x128xf32>
    %60 = tpu.matmul %24, %59, %cst_31 {dimension_numbers = #tpu.dot_dimension_numbers<[1], [0], [0], [1], [0, 0, 1, 1], [], []>} : vector<32x256xbf16>, vector<256x128xbf16>, vector<32x128xf32> -> vector<32x128xf32>
    %61 = vector.broadcast %25 : f32 to vector<1x128xf32>
    %62 = arith.mulf %61, %58 : vector<1x128xf32>
    %63 = vector.broadcast %62 : vector<1x128xf32> to vector<32x128xf32>
    %64 = arith.mulf %60, %63 : vector<32x128xf32>
    %65 = vector.extract_strided_slice %1 {offsets = [0, 128], sizes = [32, 128], strides = [1, 1]} : vector<32x256xf32> to vector<32x128xf32>
    %66 = arith.addf %64, %65 : vector<32x128xf32>
    %c0_32 = arith.constant 0 : index
    %c0_33 = arith.constant 0 : index
    %c128_34 = arith.constant 128 : index
    %67 = vector.load %arg4[%c0_32, %c0_33, %c128_34] : memref<1x32x256xf32, #tpu.memory_space<vmem>>, vector<1x32x128xf32>
    %68 = vector.shape_cast %67 : vector<1x32x128xf32> to vector<32x128xf32>
    %69 = vector.shape_cast %66 : vector<32x128xf32> to vector<1x32x128xf32>
    tpu.vector_store %arg4[%c0_32, %c0_33, %c128_34], %69 {strides = array<i32>} : memref<1x32x256xf32, #tpu.memory_space<vmem>>, vector<1x32x128xf32>,
    return
  }
  func.func @transform_0(%arg0: i32) -> (i32, i32, i32) {
    %c0_i32 = arith.constant 0 : i32
    %c0_i32_0 = arith.constant 0 : i32
    %c0_i32_1 = arith.constant 0 : i32
    return %arg0, %c0_i32, %c0_i32_0 : i32, i32, i32
  }
  func.func @transform_1(%arg0: i32) -> (i32, i32) {
    %c0_i32 = arith.constant 0 : i32
    %c0_i32_0 = arith.constant 0 : i32
    %c0_i32_1 = arith.constant 0 : i32
    return %c0_i32, %c0_i32_0 : i32, i32
  }
  func.func @transform_2(%arg0: i32) -> i32 {
    %c0_i32 = arith.constant 0 : i32
    %c0_i32_0 = arith.constant 0 : i32
    return %c0_i32 : i32
  }
  func.func @transform_3(%arg0: i32) -> (i32, i32, i32) {
    %c0_i32 = arith.constant 0 : i32
    %c0_i32_0 = arith.constant 0 : i32
    %c0_i32_1 = arith.constant 0 : i32
    return %arg0, %c0_i32, %c0_i32_0 : i32, i32, i32
  }
}

</mosaic_0001>

<bundles_post_ra>
// kernel: tpu_custom_call.1
= control target key start
LH: loop header
LB: loop body
LE: loop exit
PB: predicated region body
PF: predicated region fallthrough
CT: control target
= control target key end

     0   :  { %s3140_s0 = inlined_call_operand.hbm [shape: f32[2,32,256], index: 0, kind: input, shape index: {}]   ;;  %s3141_s1 = inlined_call_operand.hbm [shape: bf16[48,96], index: 1, kind: input, shape index: {}]   ;;  %s3142_s2 = inlined_call_operand.<no memory space> [shape: f32[1], index: 2, kind: input, shape index: {}]   ;;  %s3143_s3 = inlined_call_operand.hbm [shape: f32[2,32,256], index: 3, kind: output, shape index: {}]  }
   0x1   :  { %8 = sst [smem:[#allocation4]] %s3142_s2 }
   0x2   :  { %9 = vsyncpa [#allocation6], 0 }
   0x3   :  { %11 = vsyncpa [#allocation6 + $0x1], 0 }
   0x4   :  { %12 = vsyncpa [#allocation9], 0 }
   0x5   :  { %13 = vsyncpa [#allocation7], 0 }
   0x6   :  { %15 = vsyncpa [#allocation7 + $0x1], 0  ;;  %s2132_s14 = smov 0   ;;  %s2134_s15 = smov 0  }
   0x7   :  { %s2136_s16 = smov 0   ;;  %s2138_s17 = smov 0  }
   0x8 LB: > { %s2153_s2 = sadd.s32 4294967295, %s2095_s17   ;;  %s1480_s18 = sadd.s32 4294967294, %s2095_s17   ;;  %s2095_s17 = sphi %s2138_s17, %s3245_s17   ;;  %s2091_s16 = sphi %s2136_s16, %s3244_s16   ;;  %s2087_s15 = sphi %s2134_s15, %s3243_s15   ;;  %s2083_s14 = sphi %s2132_s14, %s3242_s14  }
   0x9   : > { %p41_p0 = scmp.ne.s32.totalorder %s2087_s15, %s2083_s14  ;;  %p3144_p1 = scmp.eq.s32.totalorder %s2153_s2, 0 }
   0xa   : > { %p113_p3 = scmp.eq.s32.totalorder %s1480_s18, 1  ;;  %p1481_p5 = scmp.ge.s32.totalorder %s2095_s17, 1 }
   0xb   : > { %p2162_p4 = por %p3144_p1, %p41_p0  ;;  %p120_p7 = scmp.lt.s32.totalorder %s2095_s17, 3 }
   0xc   : > { %p2167_p6 = por %p113_p3, %p41_p0  ;;  %s2097_s22 = smov [#allocation8]  }
   0xd   : > { %s3171_s19 = scalar_select %p2162_p4, 1, 0 }
   0xe   : > { %s3172_s20 = scalar_select %p2167_p6, 1, 0 }
   0xf   : > { %p2172_p8 = pnand %p1481_p5, %p120_p7  ;;  %s132_s23 = sshll.u32 %s2097_s22, 4  ;;  %s2176_s23 = int_to_ptr.vmem [resolvable:$true] %s132_s23 }
  0x10   : > { %s2188_s25 = sadd.s32 1, %s2095_s17   ;;  %s28_s26 = sadd.s32 1, %s2091_s16 }
  0x11   : > { %s3173_s21 = scalar_select %p2172_p8, 1, 0 }
  0x12   : > { %p1724_p9 = pneg %p2172_p8  ;;  %s25_s27 = ssub.s32 %s2095_s17, %s2188_s25 }
  0x13   : > { %s1967_s30 = scalar_lea.hbm %s3141_s1, 384 }
  0x14   : > { %p2183_p11 = pnand %p1724_p9, %p3144_p1  ;;  %p1968_p12 = scmp.ne.s32.totalorder %s3141_s1, %s1967_s30 }
  0x15   : > { %p1974_p5 = scmp.lt.u32.totalorder %s1967_s30, %s3141_s1 }
  0x16   : > { %p1969_p13 = pneg %p2183_p11 }
  0x18   : > { %p1970_p0 = pnand %p1969_p13, %p1968_p12 }
  0x1a   : > { %p1971_p3 = pneg %p1970_p0 }
  0x1c   : > { %p1976_p7 = pnand %p1974_p5, %p1971_p3 }
  0x1e   : > { %1979 = shalt.err (!%p1976_p7)
}
  0x1f   : > { %s1980_s8 = scalar_lea.vmem %s2176_s23, 384  ;;  %p1988_p2 = scmp.lt.s32.totalorder %s2176_s23, %s2176_s23 }
  0x20   : > { %p1981_p9 = scmp.ne.s32.totalorder %s2176_s23, %s1980_s8  ;;  %p1989_p6 = scmp.lt.s32.totalorder %s1980_s8, %s1980_s8 }
  0x22   : > { %p1983_p10 = pnand %p1981_p9, %p1969_p13  ;;  %p1990_p4 = por %p1989_p6, %p1988_p2 }
  0x24   : > { %p1984_p1 = pneg %p1983_p10 }
  0x26   : > { %p1991_p8 = pnand %p1990_p4, %p1984_p1 }
  0x28   : > { %1994 = shalt.err (!%p1991_p8)
}
  0x29   : > { %s2098_s9 = smov 64   ;;  %s2099_s10 = smov 4  }
  0x2a   : > { %1727 = dma.hbm_to_vmem [thread:$0]  (!%p2183_p11), %s3141_s1, 384, %s2176_s23, [#allocation9], %s2098_s9, %s2098_s9, %s2099_s10  }
  0x2b   : > { %p26_p2 = scmp.eq.s32.totalorder %s25_s27, 0  ;;  %p35_p1 = scmp.ne.s32.totalorder %s2091_s16, %s2087_s15 }
  0x2c   : > { %p36_p4 = scmp.eq.s32.totalorder %s2095_s17, 0  ;;  %p1737_p6 = scmp.lt.s32.totalorder %s2095_s17, 2 }
  0x2d   : > { %s2219_s13 = scalar_select %p26_p2, %s2091_s16, %s28_s26  }
  0x2e   : > { %p37_p8 = por %p36_p4, %p35_p1  ;;  %p3175_p10 = scmp.eq.s32.totalorder %s2153_s2, 1 }
  0x2f   : > { %s149_s22 = sand.u32 1, %s2091_s16   ;;  %s1534_s28 = sshll.u32 %s2095_s17, 10 }
  0x30   : > { %p2223_p12 = por %p3175_p10, %p35_p1  ;;  %s1484_s29 = sshll.u32 %s149_s22, 6 }
  0x31   : > { %s2232_s4 = scalar_lea.hbm %s3140_s0, %s1534_s28  ;;  %s153_s23 = scalar_lea.vmem [#allocation5], %s1484_s29 }
  0x32   : > { %s160_s26 = sshll.u32 %s153_s23, 4  ;;  %p2234_p11 = pnand %p1737_p6, %p37_p8  ;;  %s2238_s26 = int_to_ptr.vmem [resolvable:$true] %s160_s26 }
  0x33   : > { %s2240_s5 = scalar_lea.sflag [#allocation6], %s149_s22  ;;  %s1995_s6 = scalar_lea.hbm %s2232_s4, 1024 }
  0x34   : > { %p1996_p13 = scmp.ne.s32.totalorder %s2232_s4, %s1995_s6  ;;  %p1997_p0 = pneg %p2234_p11 }
  0x35   : > { %s2000_s9 = scalar_lea.hbm %s3140_s0, 2048  ;;  %p2001_p7 = scmp.lt.u32.totalorder %s2232_s4, %s3140_s0 }
  0x36   : > { %p1998_p3 = pnand %p1997_p0, %p1996_p13  ;;  %p2002_p9 = scmp.lt.u32.totalorder %s2000_s9, %s1995_s6 }
  0x37   : > { %p2004_p1 = scmp.lt.u32.totalorder %s1995_s6, %s2232_s4 }
  0x38   : > { %p1999_p5 = pneg %p1998_p3  ;;  %p2003_p2 = por %p2002_p9, %p2001_p7 }
  0x3a   : > { %p2005_p4 = por %p2004_p1, %p2003_p2 }
  0x3c   : > { %p2006_p6 = pnand %p2005_p4, %p1999_p5 }
  0x3e   : > { %2009 = shalt.err (!%p2006_p6)
}
  0x3f   : > { %s2010_s12 = scalar_lea.vmem %s2238_s26, 1024  ;;  %s2100_s22 = smov [#allocation5]  }
  0x40   : > { %p2011_p8 = scmp.ne.s32.totalorder %s2238_s26, %s2010_s12  ;;  %s2015_s28 = sshll.u32 %s2100_s22, 4  ;;  %s2016_s28 = int_to_ptr.vmem [resolvable:$false] %s2015_s28 }
  0x41   : > { %s2017_s29 = scalar_lea.vmem %s2016_s28, 2048  ;;  %p2018_p3 = scmp.lt.s32.totalorder %s2238_s26, %s2016_s28 }
  0x42   : > { %p2013_p10 = pnand %p2011_p8, %p1997_p0  ;;  %p2019_p7 = scmp.lt.s32.totalorder %s2017_s29, %s2010_s12 }
  0x44   : > { %p2014_p13 = pneg %p2013_p10  ;;  %p2020_p9 = por %p2019_p7, %p2018_p3 }
  0x46   : > { %p2021_p2 = pnand %p2020_p9, %p2014_p13 }
  0x48   : > { %2024 = shalt.err (!%p2021_p2)
}
  0x49   : > { %s2101_s24 = smov 256   ;;  %s2102_s30 = smov 16  }
  0x4a   : > { %1731 = dma.hbm_to_vmem [thread:$0]  (!%p2234_p11), %s2232_s4, 1024, %s2238_s26, %s2240_s5, %s2101_s24, %s2101_s24, %s2102_s30  }
  0x4b   : > { %p3178_p0 = scmp.ne.s32.totalorder %s3173_s21, 0 }
  0x4d   : > { %172 = sbr.rel (%p3178_p0) target bundleno = 1233 (0x4d1), region = 32 }
  0x54   : > { %s2271_s23 = sand.u32 1, %s2087_s15   ;;  %p3179_p5 = scmp.ne.s32.totalorder %s3171_s19, 0 }
  0x55   : > { %s1488_s6 = sshll.u32 %s2271_s23, 6  ;;  %s175_s7 = scalar_lea.sflag [#allocation6], %s2271_s23 }
  0x56   : > { %s2277_s8 = scalar_lea.vmem [#allocation5], %s1488_s6 }
  0x57   : > { %2070 = dma.done.wait (%p3179_p5), %s175_s7, 1024  }
  0x58   : > { %2072 = vsyncadd (%p3179_p5), %s175_s7, 4294966272  ;;  %p3180_p11 = scmp.eq.s32.totalorder %s2153_s2, 0 }
  0x5a   : > { %2074 = dma.done.wait (%p3180_p11), [#allocation9], 384   ;;  %p3181_p1 = pmov %p3180_p11 }
  0x5b   : > { %v214_v0 = vlaneseq  ;;  %v2290_v2 = vld [vmem:[%s2277_s8 + $0x20] sm:$0xff]  ;;  %v2293_v3 = vld [vmem:[%s2277_s8 + $0x30] sm:$0xff]  ;;  %v2304_v7 = vld [vmem:[%s2277_s8 + $0x28] sm:$0xff]  ;;  %s2103_s19 = smov 1   ;;  %s2104_s21 = smov 127   ;;  %v2105_v15 = vmov 0  }
  0x5c   : > { %2076 = vsyncadd (%p3181_p1), [#allocation9], 4294966912  ;;  %v2296_v4 = vld [vmem:[%s2277_s8] sm:$0xff]  ;;  %v1794_v5 = vpack.i.bf16 %v2293_v3, %v2290_v2  ;;  %v2301_v6 = vld [vmem:[%s2277_s8 + $0x10] sm:$0xff]  ;;  %410 = vmatprep.mubr.bf16.mxu0 %v2105_v15  ;;  %v347_v58 = vpack.c.bf16 %v2293_v3, %v2290_v2  ;;  %vm368_vm6 = vcmask 785408   ;;  %vm553_vm7 = vcmask 1043456  }
  0x5d   : > { %v2287_v1 = vand.u32 127, %v214_v0  ;;  %v2307_v8 = vld [vmem:[%s2277_s8 + $0x38] sm:$0xff]  ;;  %v1784_v9 = vpack.i.bf16 %v2301_v6, %v2296_v4  ;;  %v207_v10 = vld [vmem:[%s2277_s8 + $0x8] sm:$0xff]  ;;  %v345_v50 = vpack.c.bf16 %v2301_v6, %v2296_v4  ;;  %v1824_v6 = vld [vmem:[#allocation8] sm:$0xff]   ;;  %vm504_vm8 = vcmask 64512   ;;  %s469_s4 = sld [smem:[#allocation4]] }
  0x5e   : > { %v209_v11 = vld [vmem:[%s2277_s8 + $0x18] sm:$0xff]  ;;  %1795 = vrot.lane.b32.xlu1 %v1794_v5, %s2103_s19  ;;  %v1799_v12 = vpack.i.bf16 %v2307_v8, %v2304_v7  ;;  %v348_v53 = vpack.c.bf16 %v2307_v8, %v2304_v7  ;;  %s3068_s26 = scalar_lea.vmem [#allocation10], %s1488_s6  ;;  %s1535_s27 = sshll.u32 %s2153_s2, 10 }
  0x5f   : > { %1785 = vrot.lane.b32.xlu0 %v1784_v9, %s2103_s19  ;;  %v1789_v13 = vpack.i.bf16 %v209_v11, %v207_v10  ;;  %v2316_v14 = vadd.s32 128, %v2287_v1  ;;  %vm235_vm0 = vcmp.lt.s32.totalorder %v2287_v1, 1  ;;  %vm1739_vm1 = vcmp.ne.s32.totalorder %v2287_v1, 0  ;;  %s1397_s5 = sshll.u32 %s3068_s26, 4  ;;  %s3091_s11 = scalar_lea.hbm %s3143_s3, %s1535_s27  ;;  %s3093_s5 = int_to_ptr.vmem [resolvable:$true] %s1397_s5 }
  0x60   : > { %vm2333_vm2 = vmpackc.low %vm1739_vm1, %vm1739_vm1  ;;  %v346_v42 = vpack.c.bf16 %v209_v11, %v207_v10  ;;  %vm270_vm3 = vcmp.lt.s32.totalorder %v2287_v1, 127  ;;  %s1384_s2 = scalar_lea.sflag [#allocation7], %s2271_s23  ;;  %s2025_s12 = scalar_lea.vmem %s3093_s5, 1024 }
  0x61   : > { %vm1740_vm4 = vcmp.ne.s32.totalorder %v2316_v14, 255  ;;  %p2026_p4 = scmp.ne.s32.totalorder %s3093_s5, %s2025_s12  ;;  %s2106_s22 = smov [#allocation10]  }
  0x62   : > { %1800 = vrot.lane.b32.xlu1 %v1799_v12, %s2103_s19  ;;  %vm1548_vm5 = vmpackc.low %vm1740_vm4, %vm1740_vm4  ;;  %s2029_s28 = sshll.u32 %s2106_s22, 4  ;;  %s2030_s28 = int_to_ptr.vmem [resolvable:$false] %s2029_s28 }
  0x63   : > { %1790 = vrot.lane.b32.xlu0 %v1789_v13, %s2103_s19  ;;  %p2027_p6 = pnand %p2026_p4, %p2223_p12  ;;  %s2031_s29 = scalar_lea.vmem %s2030_s28, 2048 }
  0x64   : > { %p2032_p10 = scmp.lt.s32.totalorder %s3093_s5, %s2030_s28  ;;  %p2033_p13 = scmp.lt.s32.totalorder %s2031_s29, %s2025_s12 }
  0x65   : > { %p2028_p8 = pneg %p2027_p6 }
  0x66   : > { %1810 = vrot.lane.b32.xlu1 %v1789_v13, %s2104_s21  ;;  %p2034_p3 = por %p2033_p13, %p2032_p10 }
  0x67   : > { %1805 = vrot.lane.b32.xlu0 %v1784_v9, %s2104_s21 }
  0x68   : > { %p2035_p7 = pnand %p2034_p3, %p2028_p8 }
  0x6a   : > { %1820 = vrot.lane.b32.xlu1 %v1799_v12, %s2104_s21 }
  0x6b   : > { %1815 = vrot.lane.b32.xlu0 %v1794_v5, %s2104_s21 }
  0xd0   : > { %v1796_v16 = vpop.permute.xlu1 %1795 }
  0xd1   : > { %v1786_v17 = vpop.permute.xlu0 %1785  ;;  %v1797_v18 = vunpack.i.l.bf16 %v1796_v16  ;;  %v1798_v19 = vunpack.i.h.bf16 %v1796_v16 }
  0xd2   : > { %v1788_v24 = vunpack.i.h.bf16 %v1786_v17  ;;  %v1787_v25 = vunpack.i.l.bf16 %v1786_v17  ;;  %v1825_v17 = vld [vmem:[#allocation8 + $0x8] sm:$0xff]  }
  0xd4   : > { %v1801_v20 = vpop.permute.xlu1 %1800 }
  0xd5   : > { %v1803_v21 = vunpack.i.h.bf16 %v1801_v20  ;;  %v1802_v22 = vunpack.i.l.bf16 %v1801_v20  ;;  %v1791_v23 = vpop.permute.xlu0 %1790 }
  0xd6   : > { %v1793_v26 = vunpack.i.h.bf16 %v1791_v23  ;;  %v1792_v27 = vunpack.i.l.bf16 %v1791_v23 }
  0xd7   : > { %v238_v28 = vsel %vm235_vm0, %v1797_v18, %v1802_v22  ;;  %v239_v32 = vsel %vm235_vm0, %v1798_v19, %v1803_v21  ;;  %v242_v39 = vsel %vm235_vm0, %v1802_v22, %v1797_v18  ;;  %v243_v40 = vsel %vm235_vm0, %v1803_v21, %v1798_v19  ;;  %v1826_v18 = vld [vmem:[#allocation8 + $0x10] sm:$0xff]  }
  0xd8   : > { %v236_v29 = vsel %vm235_vm0, %v1787_v25, %v1792_v27  ;;  %v237_v30 = vsel %vm235_vm0, %v1788_v24, %v1793_v26  ;;  %v240_v31 = vsel %vm235_vm0, %v1792_v27, %v1787_v25  ;;  %v241_v34 = vsel %vm235_vm0, %v1793_v26, %v1788_v24  ;;  %v1811_v36 = vpop.permute.xlu1 %1810 }
  0xd9   : > { %v342_v33 = vpack.c.bf16 %v237_v30, %v236_v29  ;;  %v1806_v37 = vpop.permute.xlu0 %1805  ;;  %v1539_v38 = vpack.c.bf16 %v241_v34, %v240_v31  ;;  %v344_v41 = vpack.c.bf16 %v239_v32, %v238_v28  ;;  %v1813_v43 = vunpack.i.h.bf16 %v1811_v36 }
  0xda   : > { %v1812_v44 = vunpack.i.l.bf16 %v1811_v36  ;;  %v1808_v45 = vunpack.i.h.bf16 %v1806_v37  ;;  %v1807_v46 = vunpack.i.l.bf16 %v1806_v37  ;;  %v1544_v47 = vpack.c.bf16 %v243_v40, %v242_v39 }
  0xdb   : > { %378 = vmatprep.subr.bf16.mxu0 %v342_v33 }
  0xdc   : > { %1540 = vmatpush1.bf16.msk.msra.mxu0 %vm2333_vm2, %v1539_v38  ;;  %v1821_v48 = vpop.permute.xlu1 %1820  ;;  %v276_v51 = vsel %vm270_vm3, %v1813_v43, %v1808_v45  ;;  %v275_v52 = vsel %vm270_vm3, %v1812_v44, %v1807_v46  ;;  %v271_v60 = vsel %vm270_vm3, %v1807_v46, %v1812_v44  ;;  %v272_v61 = vsel %vm270_vm3, %v1808_v45, %v1813_v43 }
  0xdd   : > { %380 = vmatprep.subr.bf16.mxu0 %v344_v41  ;;  %v1816_v49 = vpop.permute.xlu0 %1815  ;;  %v1823_v54 = vunpack.i.h.bf16 %v1821_v48  ;;  %v1822_v55 = vunpack.i.l.bf16 %v1821_v48  ;;  %v1549_v59 = vpack.c.bf16 %v276_v51, %v275_v52  ;;  %v349_v0 = vpack.c.bf16 %v272_v61, %v271_v60 }
  0xde   : > { %v1818_v56 = vunpack.i.h.bf16 %v1816_v49  ;;  %v1817_v57 = vunpack.i.l.bf16 %v1816_v49 }
  0xe0   : > { %1545 = vmatpush1.bf16.msk.msra.mxu0 %vm2333_vm2, %v1544_v47  ;;  %v278_v62 = vsel %vm270_vm3, %v1823_v54, %v1818_v56  ;;  %v277_v63 = vsel %vm270_vm3, %v1822_v55, %v1817_v57  ;;  %v273_v2 = vsel %vm270_vm3, %v1817_v57, %v1822_v55  ;;  %v274_v3 = vsel %vm270_vm3, %v1818_v56, %v1823_v54 }
  0xe1   : > { %382 = vmatprep.subr.bf16.mxu0 %v346_v42  ;;  %v1554_v4 = vpack.c.bf16 %v278_v62, %v277_v63  ;;  %v351_v5 = vpack.c.bf16 %v274_v3, %v273_v2 }
  0xe4   : > { %383 = vmatpush1.bf16.msra.mxu0 %v345_v50 }
  0xe5   : > { %384 = vmatprep.subr.bf16.mxu0 %v348_v53 }
  0xe8   : > { %385 = vmatpush1.bf16.msra.mxu0 %v347_v58 }
  0xe9   : > { %1550 = vmatprep.subr.msk.bf16.mxu0 %vm1548_vm5, %v1549_v59 }
  0xec   : > { %387 = vmatpush1.bf16.msra.mxu0 %v349_v0 }
  0xed   : > { %1555 = vmatprep.subr.msk.bf16.mxu0 %vm1548_vm5, %v1554_v4 }
  0xf0   : > { %389 = vmatpush1.bf16.msra.mxu0 %v351_v5 }
  0xf3   : > { %1494 = vmatmul.mubr.msk.bf16.vlgmr.msra.gmra.mrb[0].mxu0 %vm368_vm6, %v1824_v6 }
  0xf4   : > { %420 = vmatprep.mubr.bf16.mxu0 %v2105_v15 }
  0xfb   : > { %1495 = vmatmul.mubr.msk.bf16.gmra.mrb[4].mxu0 %vm368_vm6, %v1825_v17 }
  0xfc   : > { %430 = vmatprep.mubr.bf16.mxu0 %v2105_v15 }
 0x103   : > { %1496 = vmatmul.mubr.msk.bf16.gmra.mrb[8].mxu0 %vm368_vm6, %v1826_v18 }
 0x1c6   : > { %v412_v7 = vpop.f32.mrb[0].mxu0 }
 0x1c7   : > { %v455_v8 = vpack.c.bf16 %v412_v7, %v412_v7  ;;  %v414_v9 = vpop.f32.mrb[1].mxu0 }
 0x1c8   : > { %v456_v10 = vpack.c.bf16 %v414_v9, %v414_v9  ;;  %v416_v11 = vpop.f32.mrb[2].mxu0 }
 0x1c9   : > { %v471_v12 = vpack.c.bf16 %v416_v11, %v416_v11  ;;  %472 = vxpose.xlu0.c.b16.start.end [1/1] (short) %v455_v8, 128  ;;  %v418_v1 = vpop.f32.mrb[3].mxu0 }
 0x1ca   : > { %v969_v13 = vpack.c.bf16 %v418_v1, %v418_v1  ;;  %488 = vxpose.xlu1.c.b16.start.end [1/1] (short) %v456_v10, 128 }
 0x1cb   : > { %1714 = vmatprep.subr.msk.bf16.mxu1 %vm553_vm7, %v471_v12  ;;  %v555_v14 = vsel %vm553_vm7, %v471_v12, 0 }
 0x1cc   : > { %v971_v16 = vsel %vm553_vm7, %v969_v13, 0  ;;  %1647 = vmatpush3.bf16.msra.mxu1 %v555_v14 }
 0x1cd   : > { %1715 = vmatprep.subr.msk.bf16.mxu1 %vm553_vm7, %v969_v13 }
 0x1ce   : > { %v422_v62 = vpop.f32.mrb[4].mxu0 }
 0x1cf   : > { %v424_v63 = vpop.f32.mrb[5].mxu0 }
 0x1d0   : > { %v426_v0 = vpop.f32.mrb[6].mxu0 }
 0x1d1   : > { %v428_v2 = vpop.f32.mrb[7].mxu0  ;;  %v2464_v9 = vpack.c.bf16 %v426_v0, %v422_v62 }
 0x1d2   : > { %v2459_v6 = vpack.c.bf16 %v428_v2, %v424_v63 }
 0x1d3   : > { %3185 = vst [vmem:[#allocation15_spill] sm:$0xff] %v2464_v9 }
 0x1d4   : > { %3184 = vst [vmem:[#allocation14_spill] sm:$0xff] %v2459_v6  ;;  %937 = vmatprep.mubr.bf16.mxu0 %v2459_v6 }
 0x1d6   : > { %v432_v1 = vpop.f32.mrb[8].mxu0 }
 0x1d7   : > { %v434_v13 = vpop.f32.mrb[9].mxu0 }
 0x22f   : > { %v480_v19 = vpop.trf.xlu0 }
 0x230   : > { %1648 = vmatprep.mubr.msk.bf16.mxu1 %vm504_vm8, %v480_v19  ;;  %v496_v23 = vpop.trf.xlu1 }
 0x233   : > { %v481_v20 = vpop.trf.xlu0 }
 0x234   : > { %1649 = vmatmul.mubr.msk.bf16.vlgmr.msra.gmra.mrb[0].mxu1 %vm504_vm8, %v481_v20  ;;  %v497_v25 = vpop.trf.xlu1 }
 0x235   : > { %1681 = vmatpush3.bf16.msra.mxu1 %v971_v16  ;;  %v436_v16 = vpop.f32.mrb[10].mxu0 }
 0x237   : > { %v482_v21 = vpop.trf.xlu0 }
 0x238   : > { %1652 = vmatprep.mubr.msk.bf16.mxu1 %vm504_vm8, %v482_v21  ;;  %v498_v27 = vpop.trf.xlu1 }
 0x23b   : > { %v483_v22 = vpop.trf.xlu0 }
 0x23c   : > { %1653 = vmatmul.mubr.msk.bf16.gmra.mrb[4].mxu1 %vm504_vm8, %v483_v22  ;;  %v499_v29 = vpop.trf.xlu1 }
 0x23f   : > { %v484_v24 = vpop.trf.xlu0 }
 0x240   : > { %1656 = vmatprep.mubr.msk.bf16.mxu1 %vm504_vm8, %v484_v24  ;;  %v500_v30 = vpop.trf.xlu1 }
 0x243   : > { %v485_v15 = vpop.trf.xlu0 }
 0x244   : > { %1657 = vmatmul.mubr.msk.bf16.gmra.mrb[8].mxu1 %vm504_vm8, %v485_v15  ;;  %v501_v31 = vpop.trf.xlu1 }
 0x247   : > { %v486_v26 = vpop.trf.xlu0 }
 0x248   : > { %1660 = vmatprep.mubr.msk.bf16.mxu1 %vm504_vm8, %v486_v26  ;;  %v502_v32 = vpop.trf.xlu1 }
 0x24b   : > { %v487_v28 = vpop.trf.xlu0 }
 0x24c   : > { %1661 = vmatmul.mubr.msk.bf16.gmra.mrb[12].mxu1 %vm504_vm8, %v487_v28  ;;  %v503_v33 = vpop.trf.xlu1 }
 0x24d   : > { %1664 = vmatprep.mubr.msk.bf16.mxu1 %vm504_vm8, %v496_v23 }
 0x254   : > { %1665 = vmatmul.mubr.msk.bf16.gmra.mrb[16].mxu1 %vm504_vm8, %v497_v25 }
 0x255   : > { %1668 = vmatprep.mubr.msk.bf16.mxu1 %vm504_vm8, %v498_v27 }
 0x25c   : > { %1669 = vmatmul.mubr.msk.bf16.gmra.mrb[20].mxu1 %vm504_vm8, %v499_v29 }
 0x25d   : > { %1672 = vmatprep.mubr.msk.bf16.mxu1 %vm504_vm8, %v500_v30 }
 0x264   : > { %1673 = vmatmul.mubr.msk.bf16.gmra.mrb[24].mxu1 %vm504_vm8, %v501_v31 }
 0x265   : > { %1676 = vmatprep.mubr.msk.bf16.mxu1 %vm504_vm8, %v502_v32 }
 0x26c   : > { %1677 = vmatmul.mubr.msk.bf16.gmra.mrb[28].mxu1 %vm504_vm8, %v503_v33 }
 0x26d   : > { %1682 = vmatprep.mubr.msk.bf16.mxu1 %vm504_vm8, %v480_v19  ;;  %v438_v19 = vpop.f32.mrb[11].mxu0 }
 0x274   : > { %1683 = vmatmul.mubr.msk.bf16.vlgmr.msra.gmra.mrb[32].mxu1 %vm504_vm8, %v481_v20 }
 0x275   : > { %1686 = vmatprep.mubr.msk.bf16.mxu1 %vm504_vm8, %v482_v21 }
 0x27c   : > { %1687 = vmatmul.mubr.msk.bf16.gmra.mrb[36].mxu1 %vm504_vm8, %v483_v22  ;;  %v2479_v22 = vpack.c.bf16 %v438_v19, %v434_v13 }
 0x27d   : > { %1690 = vmatprep.mubr.msk.bf16.mxu1 %vm504_vm8, %v484_v24 }
 0x27e   : > { %3186 = vst [vmem:[#allocation16_spill] sm:$0xff] %v2479_v22 }
 0x284   : > { %1691 = vmatmul.mubr.msk.bf16.gmra.mrb[40].mxu1 %vm504_vm8, %v485_v15  ;;  %v2484_v15 = vpack.c.bf16 %v436_v16, %v432_v1 }
 0x285   : > { %1694 = vmatprep.mubr.msk.bf16.mxu1 %vm504_vm8, %v486_v26 }
 0x286   : > { %3187 = vst [vmem:[#allocation17_spill] sm:$0xff] %v2484_v15 }
 0x28c   : > { %1695 = vmatmul.mubr.msk.bf16.gmra.mrb[44].mxu1 %vm504_vm8, %v487_v28 }
 0x28d   : > { %1698 = vmatprep.mubr.msk.bf16.mxu1 %vm504_vm8, %v496_v23 }
 0x294   : > { %1699 = vmatmul.mubr.msk.bf16.gmra.mrb[48].mxu1 %vm504_vm8, %v497_v25 }
 0x295   : > { %1702 = vmatprep.mubr.msk.bf16.mxu1 %vm504_vm8, %v498_v27 }
 0x29c   : > { %1703 = vmatmul.mubr.msk.bf16.gmra.mrb[52].mxu1 %vm504_vm8, %v499_v29 }
 0x29d   : > { %1706 = vmatprep.mubr.msk.bf16.mxu1 %vm504_vm8, %v500_v30 }
 0x2a4   : > { %1707 = vmatmul.mubr.msk.bf16.gmra.mrb[56].mxu1 %vm504_vm8, %v501_v31 }
 0x2a5   : > { %1710 = vmatprep.mubr.msk.bf16.mxu1 %vm504_vm8, %v502_v32 }
 0x2ac   : > { %1711 = vmatmul.mubr.msk.bf16.gmra.mrb[60].mxu1 %vm504_vm8, %v503_v33 }
 0x307   : > { %v2406_v34 = vpop.f32.mrb[0].mxu1 }
 0x308   : > { %v2408_v35 = vpop.f32.mrb[1].mxu1 }
 0x309   : > { %v2410_v36 = vpop.f32.mrb[2].mxu1 }
 0x30a   : > { %v2412_v37 = vpop.f32.mrb[3].mxu1 }
 0x30f   : > { %v2414_v38 = vpop.f32.mrb[4].mxu1 }
 0x310   : > { %v720_v39 = vmax.f32 %v2406_v34, %v2414_v38  ;;  %v2418_v40 = vpop.f32.mrb[5].mxu1 }
 0x311   : > { %v718_v41 = vmax.f32 %v2408_v35, %v2418_v40  ;;  %v2422_v42 = vpop.f32.mrb[6].mxu1 }
 0x312   : > { %v721_v43 = vmax.f32 %v2410_v36, %v2422_v42  ;;  %v2426_v44 = vpop.f32.mrb[7].mxu1 }
 0x313   : > { %v719_v45 = vmax.f32 %v2412_v37, %v2426_v44 }
 0x317   : > { %v2430_v46 = vpop.f32.mrb[8].mxu1 }
 0x318   : > { %v724_v47 = vmax.f32 %v720_v39, %v2430_v46  ;;  %v2433_v48 = vpop.f32.mrb[9].mxu1 }
 0x319   : > { %v722_v49 = vmax.f32 %v718_v41, %v2433_v48  ;;  %v2436_v50 = vpop.f32.mrb[10].mxu1 }
 0x31a   : > { %v725_v51 = vmax.f32 %v721_v43, %v2436_v50  ;;  %v2439_v52 = vpop.f32.mrb[11].mxu1 }
 0x31b   : > { %v723_v53 = vmax.f32 %v719_v45, %v2439_v52 }
 0x31f   : > { %v2442_v54 = vpop.f32.mrb[12].mxu1 }
 0x320   : > { %v728_v55 = vmax.f32 %v724_v47, %v2442_v54  ;;  %v2445_v56 = vpop.f32.mrb[13].mxu1 }
 0x321   : > { %v726_v57 = vmax.f32 %v722_v49, %v2445_v56  ;;  %v2448_v58 = vpop.f32.mrb[14].mxu1 }
 0x322   : > { %v729_v59 = vmax.f32 %v725_v51, %v2448_v58  ;;  %v2451_v60 = vpop.f32.mrb[15].mxu1 }
 0x323   : > { %v727_v61 = vmax.f32 %v723_v53, %v2451_v60 }
 0x327   : > { %v2454_v4 = vpop.f32.mrb[16].mxu1 }
 0x328   : > { %v732_v3 = vmax.f32 %v728_v55, %v2454_v4  ;;  %v2457_v5 = vpop.f32.mrb[17].mxu1 }
 0x329   : > { %v730_v7 = vmax.f32 %v726_v57, %v2457_v5  ;;  %v2462_v8 = vpop.f32.mrb[18].mxu1 }
 0x32a   : > { %v733_v10 = vmax.f32 %v729_v59, %v2462_v8  ;;  %v2467_v11 = vpop.f32.mrb[19].mxu1 }
 0x32b   : > { %v731_v12 = vmax.f32 %v727_v61, %v2467_v11 }
 0x32f   : > { %v2471_v14 = vpop.f32.mrb[20].mxu1 }
 0x330   : > { %v736_v17 = vmax.f32 %v732_v3, %v2471_v14  ;;  %v2474_v18 = vpop.f32.mrb[21].mxu1 }
 0x331   : > { %v734_v20 = vmax.f32 %v730_v7, %v2474_v18  ;;  %v2477_v21 = vpop.f32.mrb[22].mxu1 }
 0x332   : > { %v737_v23 = vmax.f32 %v733_v10, %v2477_v21  ;;  %v2482_v24 = vpop.f32.mrb[23].mxu1 }
 0x333   : > { %v735_v25 = vmax.f32 %v731_v12, %v2482_v24 }
 0x337   : > { %v2487_v26 = vpop.f32.mrb[24].mxu1 }
 0x338   : > { %v740_v27 = vmax.f32 %v736_v17, %v2487_v26  ;;  %v2490_v28 = vpop.f32.mrb[25].mxu1 }
 0x339   : > { %v738_v29 = vmax.f32 %v734_v20, %v2490_v28  ;;  %v2493_v30 = vpop.f32.mrb[26].mxu1 }
 0x33a   : > { %v741_v31 = vmax.f32 %v737_v23, %v2493_v30  ;;  %v2496_v32 = vpop.f32.mrb[27].mxu1 }
 0x33b   : > { %v739_v33 = vmax.f32 %v735_v25, %v2496_v32 }
 0x33f   : > { %v2499_v39 = vpop.f32.mrb[28].mxu1 }
 0x340   : > { %v744_v41 = vmax.f32 %v740_v27, %v2499_v39  ;;  %v2502_v43 = vpop.f32.mrb[29].mxu1 }
 0x341   : > { %v742_v45 = vmax.f32 %v738_v29, %v2502_v43  ;;  %v2505_v47 = vpop.f32.mrb[30].mxu1 }
 0x342   : > { %v745_v49 = vmax.f32 %v741_v31, %v2505_v47  ;;  %v2508_v51 = vpop.f32.mrb[31].mxu1 }
 0x343   : > { %v743_v53 = vmax.f32 %v739_v33, %v2508_v51 }
 0x344   : > { %v747_v55 = vmax.f32 %v744_v41, %v745_v49 }
 0x345   : > { %v746_v57 = vmax.f32 %v742_v45, %v743_v53 }
 0x347   : > { %v748_v59 = vmax.f32 %v746_v57, %v747_v55  ;;  %v2511_v61 = vpop.f32.mrb[32].mxu1 }
 0x348   : > { %v2513_v62 = vpop.f32.mrb[33].mxu1 }
 0x349   : > { %v749_v63 = vrot.slane %v748_v59, 4  ;;  %v2515_v0 = vpop.f32.mrb[34].mxu1 }
 0x34a   : > { %v2517_v2 = vpop.f32.mrb[35].mxu1 }
 0x34b   : > { %v750_v3 = vmax.f32 %v748_v59, %v749_v63 }
 0x34d   : > { %v751_v7 = vrot.slane %v750_v3, 2 }
 0x34f   : > { %v752_v10 = vmax.f32 %v750_v3, %v751_v7  ;;  %v2519_v12 = vpop.f32.mrb[36].mxu1 }
 0x350   : > { %v1136_v1 = vmax.f32 %v2511_v61, %v2519_v12  ;;  %v2523_v13 = vpop.f32.mrb[37].mxu1 }
 0x351   : > { %v753_v16 = vrot.slane %v752_v10, 1  ;;  %v1134_v17 = vmax.f32 %v2513_v62, %v2523_v13  ;;  %v2527_v19 = vpop.f32.mrb[38].mxu1 }
 0x352   : > { %v1137_v20 = vmax.f32 %v2515_v0, %v2527_v19  ;;  %v2531_v23 = vpop.f32.mrb[39].mxu1 }
 0x353   : > { %v2533_v25 = vmax.f32 %v752_v10, %v753_v16 }
 0x355   : > { %v755_v29 = vsub.f32 %v2408_v35, %v2533_v25  ;;  %v756_v31 = vsub.f32 %v2412_v37, %v2533_v25  ;;  %v757_v33 = vsub.f32 %v2406_v34, %v2533_v25  ;;  %v758_v41 = vsub.f32 %v2410_v36, %v2533_v25 }
 0x356   : > { %v759_v45 = vsub.f32 %v2418_v40, %v2533_v25  ;;  %v760_v49 = vsub.f32 %v2426_v44, %v2533_v25  ;;  %v761_v53 = vsub.f32 %v2414_v38, %v2533_v25  ;;  %v762_v35 = vsub.f32 %v2422_v42, %v2533_v25 }
 0x357   : > { %v763_v37 = vsub.f32 %v2433_v48, %v2533_v25  ;;  %v764_v34 = vsub.f32 %v2439_v52, %v2533_v25  ;;  %v765_v36 = vsub.f32 %v2430_v46, %v2533_v25  ;;  %v766_v40 = vsub.f32 %v2436_v50, %v2533_v25  ;;  %v2561_v55 = vpop.f32.mrb[40].mxu1 }
 0x358   : > { %v767_v38 = vsub.f32 %v2445_v56, %v2533_v25  ;;  %v768_v42 = vsub.f32 %v2451_v60, %v2533_v25  ;;  %v769_v44 = vsub.f32 %v2442_v54, %v2533_v25  ;;  %v770_v48 = vsub.f32 %v2448_v58, %v2533_v25  ;;  %v2571_v52 = vpop.f32.mrb[41].mxu1 }
 0x359   : > { %v771_v46 = vsub.f32 %v2457_v5, %v2533_v25  ;;  %v2581_v57 = vpop.f32.mrb[42].mxu1  ;;  %v787_v54 = vmul.f32 1.442695, %v755_v29  ;;  %v789_v7 = vmul.f32 1.442695, %v756_v31  ;;  %v1140_v10 = vmax.f32 %v1136_v1, %v2561_v55 }
 0x35a   : > { %v2591_v63 = vpop.f32.mrb[43].mxu1  ;;  %v791_v60 = vmul.f32 1.442695, %v757_v33  ;;  %v793_v56 = vmul.f32 1.442695, %v758_v41  ;;  %v1138_v16 = vmax.f32 %v1134_v17, %v2571_v52  ;;  %v1141_v17 = vmax.f32 %v1137_v20, %v2581_v57 }
 0x35b   : > { %1827 = vpow2.f32 %v787_v54  ;;  %v795_v50 = vmul.f32 1.442695, %v759_v45  ;;  %v797_v5 = vmul.f32 1.442695, %v760_v49  ;;  %v799_v59 = vmul.f32 1.442695, %v761_v53 }
 0x35c   : > { %1829 = vpow2.f32 %v789_v7  ;;  %v801_v27 = vmul.f32 1.442695, %v762_v35  ;;  %v803_v58 = vmul.f32 1.442695, %v763_v37  ;;  %v805_v3 = vmul.f32 1.442695, %v764_v34 }
 0x35d   : > { %1831 = vpow2.f32 %v791_v60  ;;  %v807_v29 = vmul.f32 1.442695, %v765_v36  ;;  %v809_v31 = vmul.f32 1.442695, %v766_v40  ;;  %v811_v1 = vmul.f32 1.442695, %v767_v38 }
 0x35e   : > { %1833 = vpow2.f32 %v793_v56  ;;  %v813_v41 = vmul.f32 1.442695, %v768_v42  ;;  %v3188_v45 = vmax.f32 %v2517_v2, %v2531_v23  ;;  %v815_v37 = vmul.f32 1.442695, %v769_v44 }
 0x35f   : > { %1835 = vpow2.f32 %v795_v50  ;;  %v2615_v33 = vpop.f32.mrb[44].mxu1  ;;  %v817_v40 = vmul.f32 1.442695, %v770_v48  ;;  %v819_v38 = vmul.f32 1.442695, %v771_v46  ;;  %v3189_v48 = vsub.f32 %v2467_v11, %v2533_v25 }
 0x360   : > { %1837 = vpow2.f32 %v797_v5  ;;  %v1139_v49 = vmax.f32 %v3188_v45, %v2591_v63  ;;  %v1144_v53 = vmax.f32 %v1140_v10, %v2615_v33  ;;  %v3192_v45 = vsub.f32 %v2474_v18, %v2533_v25 }
 0x361   : > { %1839 = vpow2.f32 %v799_v59  ;;  %v821_v46 = vmul.f32 1.442695, %v3189_v48  ;;  %v3190_v59 = vsub.f32 %v2454_v4, %v2533_v25 }
 0x362   : > { %1841 = vpow2.f32 %v801_v27  ;;  %v2622_v27 = vpop.f32.mrb[45].mxu1 }
 0x363   : > { %1843 = vpow2.f32 %v803_v58  ;;  %v1142_v34 = vmax.f32 %v1138_v16, %v2622_v27  ;;  %v2627_v20 = vpop.f32.mrb[46].mxu1 }
 0x364   : > { %1845 = vpow2.f32 %v805_v3  ;;  %v1145_v42 = vmax.f32 %v1141_v17, %v2627_v20  ;;  %v2632_v50 = vpop.f32.mrb[47].mxu1  ;;  %v823_v3 = vmul.f32 1.442695, %v3190_v59  ;;  %v3191_v17 = vsub.f32 %v2462_v8, %v2533_v25 }
 0x365   : > { %v2624_v35 = vpop.eup %1827  ;;  %1847 = vpow2.f32 %v807_v29  ;;  %v1143_v44 = vmax.f32 %v1139_v49, %v2632_v50  ;;  %v827_v49 = vmul.f32 1.442695, %v3192_v45 }
 0x366   : > { %v2629_v36 = vpop.eup %1829  ;;  %1849 = vpow2.f32 %v809_v31 }
 0x367   : > { %v2634_v56 = vpop.eup %1831  ;;  %1851 = vpow2.f32 %v811_v1  ;;  %v851_v60 = vadd.f32 %v2629_v36, %v2624_v35  ;;  %v2641_v58 = vpop.f32.mrb[48].mxu1 }
 0x368   : > { %v2643_v5 = vpop.eup %1833  ;;  %1853 = vpow2.f32 %v813_v41  ;;  %v2652_v7 = vmax.f32 %v1144_v53, %v2641_v58  ;;  %v2654_v10 = vpop.f32.mrb[49].mxu1  ;;  %v825_v41 = vmul.f32 1.442695, %v3191_v17 }
 0x369   : > { %v2656_v16 = vpop.eup %1835  ;;  %1855 = vpow2.f32 %v815_v37  ;;  %v852_v29 = vadd.f32 %v2634_v56, %v851_v60  ;;  %v2660_v31 = vmax.f32 %v1142_v34, %v2654_v10  ;;  %v2662_v1 = vpop.f32.mrb[50].mxu1 }
 0x36a   : > { %v2666_v4 = vpop.eup %1837  ;;  %1857 = vpow2.f32 %v817_v40  ;;  %v2675_v53 = vmax.f32 %v1145_v42, %v2662_v1  ;;  %v2677_v37 = vpop.f32.mrb[51].mxu1  ;;  %v3194_v42 = vsub.f32 %v2482_v24, %v2533_v25 }
 0x36b   : > { %v2679_v34 = vpop.eup %1839  ;;  %1859 = vpow2.f32 %v819_v38  ;;  %v853_v60 = vadd.f32 %v2643_v5, %v852_v29  ;;  %v2683_v40 = vmax.f32 %v1143_v44, %v2677_v37  ;;  %v3195_v38 = vsub.f32 %v2471_v14, %v2533_v25 }
 0x36c   : > { %v2689_v18 = vpop.eup %1841  ;;  %1861 = vpow2.f32 %v821_v46  ;;  %v829_v59 = vmul.f32 1.442695, %v3194_v42 }
 0x36d   : > { %v831_v17 = vmul.f32 1.442695, %v3195_v38  ;;  %v2701_v45 = vpop.eup %1843  ;;  %1863 = vpow2.f32 %v823_v3  ;;  %v854_v8 = vadd.f32 %v2656_v16, %v853_v60  ;;  %v3198_v3 = vsub.f32 %v2490_v28, %v2533_v25 }
 0x36e   : > { %v2710_v14 = vpop.eup %1845  ;;  %1865 = vpow2.f32 %v825_v41  ;;  %v3199_v28 = vsub.f32 %v2496_v32, %v2533_v25 }
 0x36f   : > { %v2687_v48 = vpop.f32.mrb[52].mxu1  ;;  %v835_v38 = vmul.f32 1.442695, %v3198_v3  ;;  %v2722_v54 = vpop.eup %1847  ;;  %1867 = vpow2.f32 %v827_v49  ;;  %v855_v24 = vadd.f32 %v2666_v4, %v854_v8  ;;  %v3200_v49 = vsub.f32 %v2487_v26, %v2533_v25 }
 0x370   : > { %3193 = vst [vmem:[#allocation18_spill] sm:$0xff] %v2687_v48  ;;  %v1152_v44 = vmax.f32 %v2652_v7, %v2687_v48  ;;  %v2699_v29 = vpop.f32.mrb[53].mxu1  ;;  %v3197_v7 = vsub.f32 %v2477_v21, %v2533_v25  ;;  %1869 = vpow2.f32 %v829_v59  ;;  %v3201_v59 = vsub.f32 %v2493_v30, %v2533_v25 }
 0x371   : > { %v1150_v46 = vmax.f32 %v2660_v31, %v2699_v29  ;;  %v2706_v11 = vpop.f32.mrb[54].mxu1  ;;  %1871 = vpow2.f32 %v831_v17  ;;  %v839_v8 = vmul.f32 1.442695, %v3200_v49  ;;  %v856_v6 = vadd.f32 %v2679_v34, %v855_v24 }
 0x372   : > { %3196 = vst [vmem:[#allocation19_spill] sm:$0xff] %v2706_v11  ;;  %v833_v42 = vmul.f32 1.442695, %v3197_v7  ;;  %v1153_v60 = vmax.f32 %v2675_v53, %v2706_v11  ;;  %v2720_v31 = vpop.f32.mrb[55].mxu1  ;;  %v2729_v7 = vpop.eup %1849  ;;  %v837_v53 = vmul.f32 1.442695, %v3199_v28  ;;  %v3202_v17 = vsub.f32 %v2502_v43, %v2533_v25 }
 0x373   : > { %v1151_v41 = vmax.f32 %v2683_v40, %v2720_v31  ;;  %v2734_v3 = vpop.eup %1851  ;;  %v841_v32 = vmul.f32 1.442695, %v3201_v59  ;;  %v857_v49 = vadd.f32 %v2689_v18, %v856_v6  ;;  %v3204_v30 = vsub.f32 %v2508_v51, %v2533_v25 }
 0x374   : > { %v2742_v21 = vpop.eup %1853  ;;  %1873 = vpow2.f32 %v833_v42  ;;  %v843_v26 = vmul.f32 1.442695, %v3202_v17 }
 0x375   : > { %v2747_v28 = vpop.eup %1855  ;;  %1875 = vpow2.f32 %v835_v38  ;;  %v845_v42 = vmul.f32 1.442695, %v3204_v30  ;;  %v3205_v38 = vsub.f32 %v2499_v39, %v2533_v25  ;;  %v858_v22 = vadd.f32 %v2701_v45, %v857_v49 }
 0x376   : > { %v2757_v15 = vpop.eup %1857  ;;  %1877 = vpow2.f32 %v837_v53  ;;  %v3208_v39 = vsub.f32 %v2505_v47, %v2533_v25 }
 0x377   : > { %v2753_v24 = vpop.f32.mrb[56].mxu1  ;;  %v847_v59 = vmul.f32 1.442695, %v3205_v38  ;;  %v1860_v6 = vpop.eup %1859  ;;  %1879 = vpow2.f32 %v839_v8  ;;  %v859_v49 = vadd.f32 %v2710_v14, %v858_v22 }
 0x378   : > { %3203 = vst [vmem:[#allocation20_spill] sm:$0xff] %v2753_v24  ;;  %v1156_v43 = vmax.f32 %v1152_v44, %v2753_v24  ;;  %v2766_v17 = vpop.f32.mrb[57].mxu1  ;;  %v1862_v53 = vpop.eup %1861  ;;  %1881 = vpow2.f32 %v841_v32  ;;  %v849_v30 = vmul.f32 1.442695, %v3208_v39 }
 0x379   : > { %3206 = vst [vmem:[#allocation21_spill] sm:$0xff] %v2766_v17  ;;  %v1154_v40 = vmax.f32 %v1150_v46, %v2766_v17  ;;  %v2770_v9 = vpop.f32.mrb[58].mxu1  ;;  %v1864_v8 = vpop.eup %1863  ;;  %1883 = vpow2.f32 %v843_v26  ;;  %v897_v46 = vpack.c.bf16 %v1862_v53, %v1860_v6  ;;  %v860_v32 = vadd.f32 %v2722_v54, %v859_v49 }
 0x37a   : > { %3207 = vst [vmem:[#allocation22_spill] sm:$0xff] %v2770_v9  ;;  %v1157_v44 = vmax.f32 %v1153_v60, %v2770_v9  ;;  %v2778_v38 = vpop.f32.mrb[59].mxu1  ;;  %v1866_v17 = vpop.eup %1865  ;;  %1885 = vpow2.f32 %v845_v42  ;;  %v3210_v60 = vpack.c.bf16 %v2629_v36, %v2624_v35 }
 0x37b   : > { %3209 = vst [vmem:[#allocation23_spill] sm:$0xff] %v2778_v38  ;;  %v1155_v24 = vmax.f32 %v1151_v41, %v2778_v38  ;;  %v1868_v51 = vpop.eup %1867  ;;  %1887 = vpow2.f32 %v847_v59  ;;  %1573 = vmatprep.subr.bf16.mxu0 %v897_v46  ;;  %v898_v47 = vpack.c.bf16 %v1866_v17, %v1864_v8  ;;  %v861_v22 = vadd.f32 %v2729_v7, %v860_v32 }
 0x37c   : > { %v1870_v25 = vpop.eup %1869  ;;  %1889 = vpow2.f32 %v849_v30  ;;  %1574 = vmatpush3.bf16.msra.mxu0 %v3210_v60  ;;  %v3214_v32 = vpack.c.bf16 %v2643_v5, %v2634_v56 }
 0x37d   : > { %v1872_v26 = vpop.eup %1871  ;;  %1575 = vmatprep.subr.bf16.mxu0 %v898_v47  ;;  %v899_v39 = vpack.c.bf16 %v1870_v25, %v1868_v51  ;;  %v862_v30 = vadd.f32 %v2734_v3, %v861_v22 }
 0x37e   : > { %v1874_v42 = vpop.eup %1873 }
 0x37f   : > { %v2787_v41 = vpop.f32.mrb[60].mxu1  ;;  %v2792_v49 = vpop.eup %1875  ;;  %v900_v46 = vpack.c.bf16 %v1874_v42, %v1872_v26  ;;  %v863_v38 = vadd.f32 %v2742_v21, %v862_v30 }
 0x380   : > { %3211 = vst [vmem:[#allocation24_spill] sm:$0xff] %v2787_v41  ;;  %v1160_v59 = vmax.f32 %v1156_v43, %v2787_v41  ;;  %v2790_v9 = vpop.f32.mrb[61].mxu1  ;;  %v2798_v60 = vpop.eup %1877  ;;  %1576 = vmatpush3.bf16.msra.mxu0 %v3214_v32 }
 0x381   : > { %3212 = vst [vmem:[#allocation25_spill] sm:$0xff] %v2790_v9  ;;  %v1158_v35 = vmax.f32 %v1154_v40, %v2790_v9  ;;  %v2796_v36 = vpop.f32.mrb[62].mxu1  ;;  %v2806_v41 = vpop.eup %1879  ;;  %1577 = vmatprep.subr.bf16.mxu0 %v899_v39  ;;  %v901_v40 = vpack.c.bf16 %v2798_v60, %v2792_v49  ;;  %v864_v56 = vadd.f32 %v2747_v28, %v863_v38 }
 0x382   : > { %3213 = vst [vmem:[#allocation26_spill] sm:$0xff] %v2796_v36  ;;  %v1161_v47 = vmax.f32 %v1157_v44, %v2796_v36  ;;  %v2804_v43 = vpop.f32.mrb[63].mxu1  ;;  %v2812_v9 = vpop.eup %1881  ;;  %v3216_v39 = vpack.c.bf16 %v2666_v4, %v2656_v16  ;;  %v3218_v16 = vpack.c.bf16 %v2689_v18, %v2679_v34 }
 0x383   : > { %v1159_v22 = vmax.f32 %v1155_v24, %v2804_v43  ;;  %v2814_v48 = vpop.eup %1883  ;;  %v902_v5 = vpack.c.bf16 %v2812_v9, %v2806_v41  ;;  %v865_v24 = vadd.f32 %v2757_v15, %v864_v56 }
 0x384   : > { %v1163_v11 = vmax.f32 %v1160_v59, %v1161_v47  ;;  %v2819_v32 = vpop.eup %1885  ;;  %1578 = vmatpush3.bf16.msra.mxu0 %v3216_v39 }
 0x385   : > { %v1162_v44 = vmax.f32 %v1158_v35, %v1159_v22  ;;  %3215 = vst [vmem:[#allocation27_spill] sm:$0xff] %v2819_v32  ;;  %v2824_v30 = vpop.eup %1887  ;;  %1579 = vmatprep.subr.bf16.mxu0 %v900_v46  ;;  %v903_v59 = vpack.c.bf16 %v2819_v32, %v2814_v48  ;;  %v866_v36 = vadd.f32 %v1860_v6, %v865_v24 }
 0x386   : > { %v2829_v38 = vpop.eup %1889  ;;  %v3219_v32 = vpack.c.bf16 %v2710_v14, %v2701_v45 }
 0x387   : > { %v1164_v47 = vmax.f32 %v1162_v44, %v1163_v11  ;;  %3217 = vst [vmem:[#allocation28_spill] sm:$0xff] %v2829_v38  ;;  %v904_v35 = vpack.c.bf16 %v2829_v38, %v2824_v30  ;;  %v867_v4 = vadd.f32 %v1862_v53, %v866_v36  ;;  %v3220_v38 = vpack.c.bf16 %v2729_v7, %v2722_v54 }
 0x388   : > { %1580 = vmatpush3.bf16.msra.mxu0 %v3218_v16 }
 0x389   : > { %v1165_v22 = vrot.slane %v1164_v47, 4  ;;  %1581 = vmatprep.subr.bf16.mxu0 %v901_v40  ;;  %v868_v56 = vadd.f32 %v1864_v8, %v867_v4  ;;  %v3225_v40 = vld [vmem:[#allocation21_spill] sm:$0xff]  ;;  %v3230_v4 = vld [vmem:[#allocation24_spill] sm:$0xff] }
 0x38b   : > { %v1166_v39 = vmax.f32 %v1164_v47, %v1165_v22  ;;  %v869_v11 = vadd.f32 %v1866_v17, %v868_v56  ;;  %v3221_v17 = vpack.c.bf16 %v2742_v21, %v2734_v3  ;;  %v3231_v56 = vld [vmem:[#allocation15_spill] sm:$0xff] }
 0x38c   : > { %1582 = vmatpush3.bf16.msra.mxu0 %v3219_v32  ;;  %v3226_v32 = vld [vmem:[#allocation23_spill] sm:$0xff] }
 0x38d   : > { %v1167_v46 = vrot.slane %v1166_v39, 2  ;;  %1583 = vmatprep.subr.bf16.mxu0 %v902_v5  ;;  %v870_v44 = vadd.f32 %v1868_v51, %v869_v11 }
 0x38f   : > { %v1168_v6 = vmax.f32 %v1166_v39, %v1167_v46  ;;  %v871_v34 = vadd.f32 %v1870_v25, %v870_v44  ;;  %v3232_v46 = vld [vmem:[#allocation26_spill] sm:$0xff] }
 0x390   : > { %1584 = vmatpush3.bf16.msra.mxu0 %v3220_v38 }
 0x391   : > { %v1169_v24 = vrot.slane %v1168_v6, 1  ;;  %1585 = vmatprep.subr.bf16.mxu0 %v903_v59  ;;  %v872_v53 = vadd.f32 %v1872_v26, %v871_v34  ;;  %v3223_v26 = vld [vmem:[#allocation18_spill] sm:$0xff]  ;;  %v3233_v34 = vld [vmem:[#allocation16_spill] sm:$0xff] }
 0x393   : > { %v2842_v18 = vmax.f32 %v1168_v6, %v1169_v24 }
 0x394   : > { %1586 = vmatpush3.bf16.msra.mxu0 %v3221_v17 }
 0x395   : > { %v1171_v8 = vsub.f32 %v2513_v62, %v2842_v18  ;;  %v1172_v45 = vsub.f32 %v2517_v2, %v2842_v18  ;;  %v1173_v14 = vsub.f32 %v2511_v61, %v2842_v18  ;;  %v1174_v54 = vsub.f32 %v2515_v0, %v2842_v18  ;;  %1587 = vmatprep.subr.bf16.mxu0 %v904_v35  ;;  %v3229_v35 = vld [vmem:[#allocation25_spill] sm:$0xff] }
 0x396   : > { %v1175_v7 = vsub.f32 %v2523_v13, %v2842_v18  ;;  %v1176_v51 = vsub.f32 %v2531_v23, %v2842_v18  ;;  %v1177_v62 = vsub.f32 %v2519_v12, %v2842_v18  ;;  %v873_v2 = vadd.f32 %v1874_v42, %v872_v53 }
 0x397   : > { %v1178_v61 = vsub.f32 %v2527_v19, %v2842_v18  ;;  %v1179_v21 = vsub.f32 %v2571_v52, %v2842_v18  ;;  %v1180_v0 = vsub.f32 %v2591_v63, %v2842_v18  ;;  %v1181_v13 = vsub.f32 %v2561_v55, %v2842_v18 }
 0x398   : > { %v1182_v23 = vsub.f32 %v2581_v57, %v2842_v18  ;;  %v1183_v12 = vsub.f32 %v2622_v27, %v2842_v18  ;;  %v1184_v3 = vsub.f32 %v2632_v50, %v2842_v18  ;;  %v874_v19 = vadd.f32 %v2792_v49, %v873_v2  ;;  %v3224_v49 = vld [vmem:[#allocation19_spill] sm:$0xff] }
 0x399   : > { %v1185_v52 = vsub.f32 %v2615_v33, %v2842_v18  ;;  %v1186_v63 = vsub.f32 %v2627_v20, %v2842_v18  ;;  %v1187_v55 = vsub.f32 %v2654_v10, %v2842_v18  ;;  %v1188_v57 = vsub.f32 %v2677_v37, %v2842_v18 }
 0x39a   : > { %v1189_v27 = vsub.f32 %v2641_v58, %v2842_v18  ;;  %v1190_v50 = vsub.f32 %v2662_v1, %v2842_v18  ;;  %v1191_v25 = vsub.f32 %v2699_v29, %v2842_v18  ;;  %v3222_v33 = vpack.c.bf16 %v2757_v15, %v2747_v28  ;;  %v3227_v15 = vld [vmem:[#allocation20_spill] sm:$0xff] }
 0x39b   : > { %v875_v20 = vadd.f32 %v2798_v60, %v874_v19  ;;  %v1192_v10 = vsub.f32 %v2720_v31, %v2842_v18  ;;  %v1193_v42 = vsub.f32 %v3223_v26, %v2842_v18  ;;  %v1194_v36 = vsub.f32 %v3224_v49, %v2842_v18  ;;  %v3228_v60 = vld [vmem:[#allocation22_spill] sm:$0xff] }
 0x39c   : > { %1588 = vmatpush3.bf16.msra.mxu0 %v3222_v33  ;;  %v1195_v5 = vsub.f32 %v3225_v40, %v2842_v18  ;;  %v1196_v59 = vsub.f32 %v3226_v32, %v2842_v18  ;;  %v1197_v28 = vsub.f32 %v3227_v15, %v2842_v18  ;;  %v1198_v47 = vsub.f32 %v3228_v60, %v2842_v18 }
 0x39d   : > { %v876_v38 = vadd.f32 %v2806_v41, %v875_v20  ;;  %v1199_v22 = vsub.f32 %v3229_v35, %v2842_v18  ;;  %v1200_v16 = vsub.f32 %v2804_v43, %v2842_v18  ;;  %v1203_v6 = vmul.f32 1.442695, %v1171_v8  ;;  %v3234_v20 = vld [vmem:[#allocation27_spill] sm:$0xff] }
 0x39e   : > { %v1205_v44 = vmul.f32 1.442695, %v1172_v45  ;;  %v1207_v24 = vmul.f32 1.442695, %v1173_v14  ;;  %v1209_v53 = vmul.f32 1.442695, %v1174_v54 }
 0x39f   : > { %938 = vmatmul.mubr.bf16.vlgmr.msra.gmra.mrb[12].mxu0 %v3231_v56  ;;  %v877_v41 = vadd.f32 %v2812_v9, %v876_v38  ;;  %1891 = vpow2.f32 %v1203_v6  ;;  %v1211_v17 = vmul.f32 1.442695, %v1175_v7  ;;  %v1213_v19 = vmul.f32 1.442695, %v1176_v51  ;;  %v3235_v9 = vld [vmem:[#allocation17_spill] sm:$0xff]  ;;  %v3236_v7 = vld [vmem:[#allocation14_spill] sm:$0xff] }
 0x3a0   : > { %945 = vmatprep.mubr.bf16.mxu0 %v3233_v34  ;;  %1893 = vpow2.f32 %v1205_v44  ;;  %v1215_v33 = vmul.f32 1.442695, %v1177_v62  ;;  %v1217_v11 = vmul.f32 1.442695, %v1178_v61  ;;  %v1219_v8 = vmul.f32 1.442695, %v1179_v21 }
 0x3a1   : > { %v878_v2 = vadd.f32 %v2814_v48, %v877_v41  ;;  %1895 = vpow2.f32 %v1207_v24  ;;  %v1221_v14 = vmul.f32 1.442695, %v1180_v0  ;;  %v1223_v54 = vmul.f32 1.442695, %v1181_v13  ;;  %v3237_v48 = vld [vmem:[#allocation28_spill] sm:$0xff] }
 0x3a2   : > { %1897 = vpow2.f32 %v1209_v53  ;;  %v1225_v62 = vmul.f32 1.442695, %v1182_v23  ;;  %v1227_v38 = vmul.f32 1.442695, %v1183_v12  ;;  %v1229_v61 = vmul.f32 1.442695, %v1184_v3 }
 0x3a3   : > { %v879_v39 = vadd.f32 %v3234_v20, %v878_v2  ;;  %1899 = vpow2.f32 %v1211_v17  ;;  %v1235_v6 = vmul.f32 1.442695, %v1187_v55  ;;  %v1237_v3 = vmul.f32 1.442695, %v1188_v57 }
 0x3a4   : > { %1901 = vpow2.f32 %v1213_v19  ;;  %v1241_v37 = vmul.f32 1.442695, %v1190_v50  ;;  %v1243_v58 = vmul.f32 1.442695, %v1191_v25  ;;  %v1245_v1 = vmul.f32 1.442695, %v1192_v10 }
 0x3a5   : > { %v880_v45 = vadd.f32 %v2824_v30, %v879_v39  ;;  %1903 = vpow2.f32 %v1215_v33  ;;  %v1231_v30 = vmul.f32 1.442695, %v1185_v52  ;;  %v1233_v39 = vmul.f32 1.442695, %v1186_v63 }
 0x3a6   : > { %1905 = vpow2.f32 %v1217_v11  ;;  %v1239_v63 = vmul.f32 1.442695, %v1189_v27  ;;  %v1247_v29 = vmul.f32 1.442695, %v1193_v42  ;;  %v1249_v31 = vmul.f32 1.442695, %v1194_v36 }
 0x3a7   : > { %946 = vmatmul.mubr.bf16.gmra.mrb[16].mxu0 %v3235_v9  ;;  %v2926_v51 = vadd.f32 %v3237_v48, %v880_v45  ;;  %1907 = vpow2.f32 %v1219_v8  ;;  %v1251_v26 = vmul.f32 1.442695, %v1195_v5  ;;  %v1253_v49 = vmul.f32 1.442695, %v1196_v59 }
 0x3a8   : > { %1353 = vmatprep.mubr.bf16.mxu0 %v3236_v7  ;;  %1909 = vpow2.f32 %v1221_v14  ;;  %v1255_v40 = vmul.f32 1.442695, %v1197_v28  ;;  %v1257_v32 = vmul.f32 1.442695, %v1198_v47  ;;  %v1259_v15 = vmul.f32 1.442695, %v1199_v22 }
 0x3a9   : > { %v2928_v21 = vpop.eup %1891  ;;  %1911 = vpow2.f32 %v1223_v54  ;;  %v1261_v60 = vmul.f32 1.442695, %v1200_v16  ;;  %v3238_v54 = vsub.f32 %v3230_v4, %v2842_v18 }
 0x3aa   : > { %v2930_v0 = vpop.eup %1893  ;;  %1913 = vpow2.f32 %v1225_v62  ;;  %v3239_v62 = vsub.f32 %v3232_v46, %v2842_v18 }
 0x3ab   : > { %v2932_v13 = vpop.eup %1895  ;;  %1915 = vpow2.f32 %v1227_v38  ;;  %v1267_v11 = vadd.f32 %v2930_v0, %v2928_v21  ;;  %v1305_v23 = vpack.c.bf16 %v2930_v0, %v2928_v21  ;;  %v1263_v7 = vmul.f32 1.442695, %v3238_v54 }
 0x3ac   : > { %v2938_v12 = vpop.eup %1897  ;;  %1917 = vpow2.f32 %v1229_v61  ;;  %v1265_v38 = vmul.f32 1.442695, %v3239_v62 }
 0x3ad   : > { %v2943_v52 = vpop.eup %1899  ;;  %1919 = vpow2.f32 %v1231_v30  ;;  %v1268_v55 = vadd.f32 %v2932_v13, %v1267_v11  ;;  %v1306_v44 = vpack.c.bf16 %v2938_v12, %v2932_v13 }
 0x3ae   : > { %v2951_v24 = vpop.eup %1901  ;;  %1921 = vpow2.f32 %v1233_v39 }
 0x3af   : > { %v2956_v57 = vpop.eup %1903  ;;  %1923 = vpow2.f32 %v1235_v6  ;;  %v1269_v27 = vadd.f32 %v2938_v12, %v1268_v55  ;;  %v1307_v41 = vpack.c.bf16 %v2951_v24, %v2943_v52 }
 0x3b0   : > { %v2964_v53 = vpop.eup %1905  ;;  %1925 = vpow2.f32 %v1237_v3 }
 0x3b1   : > { %v2969_v50 = vpop.eup %1907  ;;  %1927 = vpow2.f32 %v1239_v63  ;;  %v1270_v25 = vadd.f32 %v2943_v52, %v1269_v27  ;;  %v1308_v17 = vpack.c.bf16 %v2964_v53, %v2956_v57 }
 0x3b2   : > { %v2977_v2 = vpop.eup %1909  ;;  %1929 = vpow2.f32 %v1241_v37 }
 0x3b3   : > { %v2982_v10 = vpop.eup %1911  ;;  %1931 = vpow2.f32 %v1243_v58  ;;  %v1271_v42 = vadd.f32 %v2951_v24, %v1270_v25  ;;  %v1309_v19 = vpack.c.bf16 %v2977_v2, %v2969_v50 }
 0x3b4   : > { %v2990_v33 = vpop.eup %1913  ;;  %1933 = vpow2.f32 %v1245_v1 }
 0x3b5   : > { %v2995_v36 = vpop.eup %1915  ;;  %1935 = vpow2.f32 %v1247_v29  ;;  %v1272_v5 = vadd.f32 %v2956_v57, %v1271_v42  ;;  %v1310_v20 = vpack.c.bf16 %v2990_v33, %v2982_v10 }
 0x3b6   : > { %v3003_v8 = vpop.eup %1917  ;;  %1937 = vpow2.f32 %v1249_v31 }
 0x3b7   : > { %v3008_v59 = vpop.eup %1919  ;;  %1939 = vpow2.f32 %v1251_v26  ;;  %v1273_v28 = vadd.f32 %v2964_v53, %v1272_v5  ;;  %v1311_v45 = vpack.c.bf16 %v3003_v8, %v2995_v36 }
 0x3b8   : > { %v3016_v14 = vpop.eup %1921  ;;  %1941 = vpow2.f32 %v1253_v49 }
 0x3b9   : > { %v1924_v47 = vpop.eup %1923  ;;  %1943 = vpow2.f32 %v1255_v40  ;;  %v1274_v35 = vadd.f32 %v2969_v50, %v1273_v28  ;;  %v1312_v22 = vpack.c.bf16 %v3016_v14, %v3008_v59 }
 0x3ba   : > { %v1926_v48 = vpop.eup %1925  ;;  %1945 = vpow2.f32 %v1257_v32 }
 0x3bb   : > { %v1928_v61 = vpop.eup %1927  ;;  %1947 = vpow2.f32 %v1259_v15  ;;  %v1275_v43 = vadd.f32 %v2977_v2, %v1274_v35  ;;  %v1313_v16 = vpack.c.bf16 %v1926_v48, %v1924_v47 }
 0x3bc   : > { %v1930_v30 = vpop.eup %1929  ;;  %1949 = vpow2.f32 %v1261_v60 }
 0x3bd   : > { %v1932_v4 = vpop.eup %1931  ;;  %1951 = vpow2.f32 %v1263_v7  ;;  %v1276_v39 = vadd.f32 %v2982_v10, %v1275_v43  ;;  %1618 = vmatprep.subr.bf16.mxu0 %v1313_v16  ;;  %v1314_v6 = vpack.c.bf16 %v1930_v30, %v1928_v61 }
 0x3be   : > { %v1934_v11 = vpop.eup %1933  ;;  %1953 = vpow2.f32 %v1265_v38  ;;  %1619 = vmatpush3.bf16.msra.mxu0 %v1305_v23 }
 0x3bf   : > { %v1936_v18 = vpop.eup %1935  ;;  %v1277_v46 = vadd.f32 %v2990_v33, %v1276_v39  ;;  %1620 = vmatprep.subr.bf16.mxu0 %v1314_v6  ;;  %v1315_v3 = vpack.c.bf16 %v1934_v11, %v1932_v4  ;;  %v1959_v6 = vld [vmem:[%s2277_s8] sm:$0xff] }
 0x3c0   : > { %v1938_v63 = vpop.eup %1937 }
 0x3c1   : > { %v1940_v55 = vpop.eup %1939  ;;  %v1278_v37 = vadd.f32 %v2995_v36, %v1277_v46  ;;  %v1316_v58 = vpack.c.bf16 %v1938_v63, %v1936_v18 }
 0x3c2   : > { %v1942_v27 = vpop.eup %1941  ;;  %1621 = vmatpush3.bf16.msra.mxu0 %v1306_v44 }
 0x3c3   : > { %v1944_v1 = vpop.eup %1943  ;;  %v1279_v29 = vadd.f32 %v3003_v8, %v1278_v37  ;;  %1622 = vmatprep.subr.bf16.mxu0 %v1315_v3  ;;  %v1317_v21 = vpack.c.bf16 %v1942_v27, %v1940_v55 }
 0x3c4   : > { %v1946_v0 = vpop.eup %1945 }
 0x3c5   : > { %v1948_v23 = vpop.eup %1947  ;;  %v1280_v25 = vadd.f32 %v3008_v59, %v1279_v29  ;;  %v1318_v31 = vpack.c.bf16 %v1946_v0, %v1944_v1  ;;  %v1961_v29 = vld [vmem:[%s2277_s8 + $0x20] sm:$0xff] }
 0x3c6   : > { %v1950_v26 = vpop.eup %1949  ;;  %1623 = vmatpush3.bf16.msra.mxu0 %v1307_v41 }
 0x3c7   : > { %v1952_v42 = vpop.eup %1951  ;;  %v1281_v49 = vadd.f32 %v3016_v14, %v1280_v25  ;;  %1624 = vmatprep.subr.bf16.mxu0 %v1316_v58  ;;  %v1319_v13 = vpack.c.bf16 %v1950_v26, %v1948_v23 }
 0x3c8   : > { %v1954_v12 = vpop.eup %1953 }
 0x3c9   : > { %v1282_v44 = vadd.f32 %v1924_v47, %v1281_v49  ;;  %v1320_v40 = vpack.c.bf16 %v1954_v12, %v1952_v42  ;;  %v954_v47 = vstv %s469_s4 }
 0x3ca   : > { %1625 = vmatpush3.bf16.msra.mxu0 %v1308_v17 }
 0x3cb   : > { %v1283_v5 = vadd.f32 %v1926_v48, %v1282_v44  ;;  %1626 = vmatprep.subr.bf16.mxu0 %v1317_v21 }
 0x3cd   : > { %v1284_v32 = vadd.f32 %v1928_v61, %v1283_v5 }
 0x3ce   : > { %1627 = vmatpush3.bf16.msra.mxu0 %v1309_v19 }
 0x3cf   : > { %v1285_v52 = vadd.f32 %v1930_v30, %v1284_v32  ;;  %1628 = vmatprep.subr.bf16.mxu0 %v1318_v31 }
 0x3d1   : > { %v1286_v24 = vadd.f32 %v1932_v4, %v1285_v52  ;;  %v1964_v52 = vld [vmem:[%s2277_s8 + $0x18] sm:$0xff] }
 0x3d2   : > { %1629 = vmatpush3.bf16.msra.mxu0 %v1310_v20 }
 0x3d3   : > { %v1287_v41 = vadd.f32 %v1934_v11, %v1286_v24  ;;  %1630 = vmatprep.subr.bf16.mxu0 %v1319_v13 }
 0x3d5   : > { %v1288_v59 = vadd.f32 %v1936_v18, %v1287_v41  ;;  %v1960_v18 = vld [vmem:[%s2277_s8 + $0x10] sm:$0xff] }
 0x3d6   : > { %1631 = vmatpush3.bf16.msra.mxu0 %v1311_v45 }
 0x3d7   : > { %v1289_v57 = vadd.f32 %v1938_v63, %v1288_v59  ;;  %1632 = vmatprep.subr.bf16.mxu0 %v1320_v40  ;;  %v1963_v40 = vld [vmem:[%s2277_s8 + $0x8] sm:$0xff] }
 0x3d9   : > { %v1290_v53 = vadd.f32 %v1940_v55, %v1289_v57 }
 0x3da   : > { %1633 = vmatpush3.bf16.msra.mxu0 %v1312_v22 }
 0x3db   : > { %v1291_v50 = vadd.f32 %v1942_v27, %v1290_v53 }
 0x3dd   : > { %v1292_v17 = vadd.f32 %v1944_v1, %v1291_v50  ;;  %1354 = vmatmul.mubr.bf16.vlgmr.msra.gmra.mrb[20].mxu0 %v3231_v56 }
 0x3de   : > { %1361 = vmatprep.mubr.bf16.mxu0 %v3233_v34  ;;  %v882_v34 = vrot.slane %v2926_v51, 4 }
 0x3df   : > { %v1293_v2 = vadd.f32 %v1946_v0, %v1292_v17 }
 0x3e0   : > { %v883_v54 = vadd.f32 %v882_v34, %v2926_v51 }
 0x3e1   : > { %v1294_v10 = vadd.f32 %v1948_v23, %v1293_v2  ;;  %v1962_v23 = vld [vmem:[%s2277_s8 + $0x30] sm:$0xff] }
 0x3e2   : > { %v884_v7 = vrot.slane %v883_v54, 2 }
 0x3e3   : > { %v1295_v19 = vadd.f32 %v1950_v26, %v1294_v10  ;;  %v1965_v10 = vld [vmem:[%s2277_s8 + $0x28] sm:$0xff] }
 0x3e5   : > { %v1296_v33 = vadd.f32 %v1952_v42, %v1295_v19  ;;  %1362 = vmatmul.mubr.bf16.gmra.mrb[24].mxu0 %v3235_v9  ;;  %v885_v9 = vadd.f32 %v884_v7, %v883_v54 }
 0x3e7   : > { %v1297_v20 = vadd.f32 %v1954_v12, %v1296_v33  ;;  %v886_v35 = vrot.slane %v885_v9, 1 }
 0x3e9   : > { %v1298_v15 = vrot.slane %v1297_v20, 4  ;;  %v887_v22 = vadd.f32 %v886_v35, %v885_v9 }
 0x3eb   : > { %v1299_v36 = vadd.f32 %v1298_v15, %v1297_v20  ;;  %v1966_v20 = vld [vmem:[%s2277_s8 + $0x38] sm:$0xff] }
 0x3ed   : > { %v1300_v8 = vrot.slane %v1299_v36, 2 }
 0x3ef   : > { %v1301_v28 = vadd.f32 %v1300_v8, %v1299_v36 }
 0x3f1   : > { %v1302_v45 = vrot.slane %v1301_v28, 1 }
 0x3f3   : > { %v1303_v14 = vadd.f32 %v1302_v45, %v1301_v28 }
 0x3f5   : > { %1955 = vrcp.f32 %v1303_v14 }
 0x3f6   : > { %1957 = vrcp.f32 %v887_v22 }
 0x3ff   : > { %v1956_v60 = vpop.eup %1955 }
 0x400   : > { %v3061_v56 = vmul.f32 %v1956_v60, %v954_v47  ;;  %v1958_v48 = vpop.eup %1957 }
 0x401   : > { %v955_v43 = vmul.f32 %v1958_v48, %v954_v47 }
 0x472   : > { %v1589_v62 = vpop.f32.mrb[12].mxu0 }
 0x473   : > { %v1590_v38 = vpop.f32.mrb[13].mxu0 }
 0x474   : > { %v1591_v61 = vadd.f32 %v1590_v38, %v1589_v62  ;;  %v1592_v16 = vpop.f32.mrb[14].mxu0 }
 0x475   : > { %v1593_v30 = vpop.f32.mrb[15].mxu0 }
 0x476   : > { %v956_v4 = vmul.f32 %v1591_v61, %v955_v43  ;;  %v1594_v39 = vadd.f32 %v1593_v30, %v1592_v16 }
 0x478   : > { %v960_v11 = vadd.f32 %v1959_v6, %v956_v4  ;;  %v957_v51 = vmul.f32 %v1594_v39, %v955_v43 }
 0x47a   : > { %964 = vst [vmem:[%s3068_s26] sm:$0xff] %v960_v11  ;;  %v961_v46 = vadd.f32 %v1960_v18, %v957_v51  ;;  %v1595_v3 = vpop.f32.mrb[16].mxu0 }
 0x47b   : > { %v1596_v63 = vpop.f32.mrb[17].mxu0 }
 0x47c   : > { %965 = vst [vmem:[%s3068_s26 + $0x10] sm:$0xff] %v961_v46  ;;  %v1597_v55 = vadd.f32 %v1596_v63, %v1595_v3  ;;  %v1598_v37 = vpop.f32.mrb[18].mxu0 }
 0x47d   : > { %v1599_v58 = vpop.f32.mrb[19].mxu0 }
 0x47e   : > { %v958_v27 = vmul.f32 %v1597_v55, %v955_v43  ;;  %v1600_v1 = vadd.f32 %v1599_v58, %v1598_v37 }
 0x480   : > { %v962_v21 = vadd.f32 %v1961_v29, %v958_v27  ;;  %v959_v0 = vmul.f32 %v1600_v1, %v955_v43 }
 0x482   : > { %966 = vst [vmem:[%s3068_s26 + $0x20] sm:$0xff] %v962_v21  ;;  %v963_v25 = vadd.f32 %v1962_v23, %v959_v0 }
 0x484   : > { %967 = vst [vmem:[%s3068_s26 + $0x30] sm:$0xff] %v963_v25 }
 0x4b0   : > { %v1634_v31 = vpop.f32.mrb[20].mxu0 }
 0x4b1   : > { %v1635_v26 = vpop.f32.mrb[21].mxu0 }
 0x4b2   : > { %v1636_v42 = vadd.f32 %v1635_v26, %v1634_v31  ;;  %v1637_v49 = vpop.f32.mrb[22].mxu0 }
 0x4b3   : > { %v1638_v13 = vpop.f32.mrb[23].mxu0 }
 0x4b4   : > { %v1371_v12 = vmul.f32 %v1636_v42, %v3061_v56  ;;  %v1639_v44 = vadd.f32 %v1638_v13, %v1637_v49 }
 0x4b6   : > { %v1375_v5 = vadd.f32 %v1963_v40, %v1371_v12  ;;  %v1372_v32 = vmul.f32 %v1639_v44, %v3061_v56 }
 0x4b8   : > { %1379 = vst [vmem:[%s3068_s26 + $0x8] sm:$0xff] %v1375_v5  ;;  %v1376_v24 = vadd.f32 %v1964_v52, %v1372_v32  ;;  %v1640_v41 = vpop.f32.mrb[24].mxu0 }
 0x4b9   : > { %v1641_v59 = vpop.f32.mrb[25].mxu0 }
 0x4ba   : > { %1380 = vst [vmem:[%s3068_s26 + $0x18] sm:$0xff] %v1376_v24  ;;  %v1642_v57 = vadd.f32 %v1641_v59, %v1640_v41  ;;  %v1643_v53 = vpop.f32.mrb[26].mxu0 }
 0x4bb   : > { %v1644_v50 = vpop.f32.mrb[27].mxu0 }
 0x4bc   : > { %v1373_v17 = vmul.f32 %v1642_v57, %v3061_v56  ;;  %v1645_v2 = vadd.f32 %v1644_v50, %v1643_v53 }
 0x4be   : > { %v1377_v19 = vadd.f32 %v1965_v10, %v1373_v17  ;;  %v1374_v33 = vmul.f32 %v1645_v2, %v3061_v56 }
 0x4c0   : > { %1381 = vst [vmem:[%s3068_s26 + $0x28] sm:$0xff] %v1377_v19  ;;  %v1378_v15 = vadd.f32 %v1966_v20, %v1374_v33 }
 0x4c2   : > { %1382 = vst [vmem:[%s3068_s26 + $0x38] sm:$0xff] %v1378_v15 }
 0x4c3   : > { %2038 = shalt.err (!%p2035_p7)
}
 0x4c4   : > { %s2039_s24 = scalar_lea.hbm %s3091_s11, 1024  ;;  %s2043_s7 = scalar_lea.hbm %s3143_s3, 2048 }
 0x4c5   : > { %p2040_p9 = scmp.ne.s32.totalorder %s3091_s11, %s2039_s24  ;;  %p2044_p5 = scmp.lt.u32.totalorder %s3091_s11, %s3143_s3 }
 0x4c6   : > { %p2045_p11 = scmp.lt.u32.totalorder %s2043_s7, %s2039_s24  ;;  %p2047_p4 = scmp.lt.u32.totalorder %s2039_s24, %s3091_s11 }
 0x4c7   : > { %p2041_p2 = pnand %p2040_p9, %p2223_p12 }
 0x4c8   : > { %p2046_p1 = por %p2045_p11, %p2044_p5 }
 0x4c9   : > { %p2042_p0 = pneg %p2041_p2 }
 0x4ca   : > { %p2048_p6 = por %p2047_p4, %p2046_p1 }
 0x4cc   : > { %p2049_p8 = pnand %p2048_p6, %p2042_p0 }
 0x4ce   : > { %2052 = shalt.err (!%p2049_p8)
}
 0x4cf   : > { %s2107_s21 = smov 256   ;;  %s2108_s4 = smov 16  }
 0x4d0   : > { %1722 = dma.vmem_to_hbm [thread:$0]  (%p2223_p12), %s3093_s5, 1024, %s3091_s11, %s1384_s2, %s2107_s21, %s2107_s21, %s2108_s4  }
 0x4d1 PF: > { %s1412_s26 = sand.u32 1, %s2083_s14   ;;  %p3240_p10 = scmp.ne.s32.totalorder %s3172_s20, 0 }
 0x4d2   : > { %p3241_p13 = scmp.ge.s32.totalorder %s2095_s17, 2  ;;  %s1413_s27 = scalar_lea.sflag [#allocation7], %s1412_s26 }
 0x4d4   : > { %p1733_p3 = pnand %p3241_p13, %p3240_p10 }
 0x4d6   : > { %2078 = dma.done.wait (!%p1733_p3), %s1413_s27, 1024  }
 0x4d7   : > { %2080 = vsyncadd (!%p1733_p3), %s1413_s27, 4294966272  ;;  %p18_p7 = scmp.ge.s32.totalorder %s2188_s25, 4   ;;  %s3242_s14 = smov %s2087_s15 }
 0x4d8   : > { %s3243_s15 = smov %s2091_s16  ;;  %s3244_s16 = smov %s2219_s13 }
 0x4d9   : > { %s3245_s17 = smov %s2188_s25  ;;  %20 = sbr.rel (!%p18_p7) target bundleno = 8 (0x8), region = 81 }
 0x4e0   :  { %1418 = vsyncpa [#allocation6], 1 }
 0x4e1   :  { %1420 = vsyncpa [#allocation6 + $0x1], 1 }
 0x4e2   :  { %1421 = vsyncpa [#allocation9], 1 }
 0x4e3   :  { %1422 = vsyncpa [#allocation7], 1 }
 0x4e4   :  { %1424 = vsyncpa [#allocation7 + $0x1], 1 }

</bundles_post_ra>
